<compile_context>
chip_gen: v5e
topology: v5e:2x2
jax: 0.10.0
libtpu: 0.0.40
codegen_flags: <defaults>
</compile_context>

<pallas_src>
import functools

import jax
import jax.numpy as jnp
import numpy as np
from jax import lax
from jax.experimental import pallas as pl
from jax.experimental.pallas import tpu as pltpu


# ----------------------------- Pallas kernel ------------------------------


def wavenet_kernel(
    x_ref,                                   # (Bb, T, Cin)
    w_in0_ref, w_in1_ref, b_in_ref,          # (Cin,R), (Cin,R), (1,R)
    wfg0_ref, wfg1_ref, bfg_ref,             # (L,R,2R), (L,R,2R), (L,1,2R)
    wrs_ref, brs_ref,                        # (L,R,R+S), (L,1,R+S)
    wo1_ref, bo1_ref,                        # (S,O), (1,O)
    wo2_ref, bo2_ref,                        # (O,Opad), (1,Opad)
    out_ref,                                 # (Bb, T, Opad)
    *, blocks, dilation_depth,
):
    Bb, T, Cin = x_ref.shape
    R = w_in0_ref.shape[1]
    S = wo1_ref.shape[0]
    M = Bb * T

    x = x_ref[...].astype(jnp.float32).reshape(M, Cin)

    # Per-row within-sequence time index — built once, reused by every layer.
    tpos = lax.broadcasted_iota(jnp.int32, (M, 1), 0) % T
    dils = sorted({1} | {2 ** dep for dep in range(dilation_depth)})
    causal_mask = {d: tpos < d for d in dils}

    def shift(h, d):
        # y[b, t] = h[b, t - d] for t >= d, else 0.  Batch rows are contiguous
        # blocks of T, so a flat sublane roll is correct once the rows with
        # t < d (exactly the ones that wrapped across a sequence boundary)
        # are masked to zero.  XLU roll + VPU select: no MXU, O(M*C).
        rolled = pltpu.roll(h, shift=d, axis=0)
        return jnp.where(causal_mask[d], 0.0, rolled)

    # Input causal conv (kernel_size=2, dilation=1).
    h = (jnp.dot(shift(x, 1), w_in0_ref[...], preferred_element_type=jnp.float32)
         + jnp.dot(x, w_in1_ref[...], preferred_element_type=jnp.float32)
         + b_in_ref[...])                                    # (M, R)

    skip_sum = jnp.zeros((M, S), jnp.float32)

    layer = 0
    for _blk in range(blocks):
        for dep in range(dilation_depth):
            d = 2 ** dep
            h_d = shift(h, d)

            # Fused filter|gate pre-activations: one (M,R)@(R,2R) per input.
            z = (jnp.dot(h_d, wfg0_ref[layer], preferred_element_type=jnp.float32)
                 + jnp.dot(h, wfg1_ref[layer], preferred_element_type=jnp.float32)
                 + bfg_ref[layer])                           # (M, 2R)
            gated = jnp.tanh(z[:, :R]) * jax.nn.sigmoid(z[:, R:])

            # Fused residual|skip 1x1 convs (skip conv folded in the wrapper).
            rs = (jnp.dot(gated, wrs_ref[layer], preferred_element_type=jnp.float32)
                  + brs_ref[layer])                          # (M, R+S)
            h = h + rs[:, :R]
            skip_sum = skip_sum + rs[:, R:]
            layer += 1

    out = jnp.maximum(skip_sum, 0.0)
    out = jnp.maximum(
        jnp.dot(out, wo1_ref[...], preferred_element_type=jnp.float32) + bo1_ref[...],
        0.0)
    out = jnp.dot(out, wo2_ref[...], preferred_element_type=jnp.float32) + bo2_ref[...]
    out_ref[...] = out.reshape(Bb, T, -1).astype(out_ref.dtype)


# ------------------------------- Wrapper -----------------------------------


def _pick_batch_block(B, max_bb=8):
    for cand in range(min(B, max_bb), 0, -1):
        if B % cand == 0:
            return cand
    return 1


def wavenet_forward(x_nct, params, *, blocks, dilation_depth, batch_block=None):
    """x_nct: (B, input_size, T) — PyTorch layout.  Returns (B, out_size, T)."""
    B, Cin, T = x_nct.shape
    x_btc = jnp.transpose(x_nct, (0, 2, 1)).astype(jnp.float32)   # (B, T, Cin)

    R = params["w_in0"].shape[1]
    S = params["ws"].shape[2]
    O = params["wo2"].shape[1]
    O_pad = ((O + 127) // 128) * 128          # lane-dense output store

    # --- one-time weight packing (fusion + padding) ---
    wfg0 = jnp.concatenate([params["wf0"], params["wg0"]], axis=-1)   # (L,R,2R)
    wfg1 = jnp.concatenate([params["wf1"], params["wg1"]], axis=-1)   # (L,R,2R)
    bfg = jnp.concatenate([params["bf"], params["bg"]], axis=-1)      # (L,1,2R)

    wr, br, ws, bs = params["wr"], params["br"], params["ws"], params["bs"]
    wrs = jnp.concatenate(
        [wr, jnp.einsum("lij,ljk->lik", wr, ws)], axis=-1)            # (L,R,R+S)
    brs = jnp.concatenate(
        [br, jnp.einsum("lij,ljk->lik", br, ws) + bs], axis=-1)       # (L,1,R+S)

    wo2p = jnp.zeros((O, O_pad), jnp.float32).at[:, :O].set(params["wo2"])
    bo2p = jnp.zeros((1, O_pad), jnp.float32).at[:, :O].set(params["bo2"])

    weights = [params["w_in0"], params["w_in1"], params["b_in"],
               wfg0, wfg1, bfg, wrs, brs,
               params["wo1"], params["bo1"], wo2p, bo2p]

    Bb = batch_block if batch_block is not None else _pick_batch_block(B)
    assert B % Bb == 0

    def full_spec(arr):
        nd = arr.ndim
        return pl.BlockSpec(arr.shape, lambda b, nd=nd: (0,) * nd)

    in_specs = [pl.BlockSpec((Bb, T, Cin), lambda b: (b, 0, 0))]
    in_specs += [full_spec(w) for w in weights]
    out_specs = pl.BlockSpec((Bb, T, O_pad), lambda b: (b, 0, 0))

    out_padded = pl.pallas_call(
        functools.partial(wavenet_kernel, blocks=blocks,
                          dilation_depth=dilation_depth),
        grid=(B // Bb,),
        in_specs=in_specs,
        out_specs=out_specs,
        out_shape=jax.ShapeDtypeStruct((B, T, O_pad), jnp.float32),
        compiler_params=pltpu.CompilerParams(
            dimension_semantics=("parallel",),
            vmem_limit_bytes=48 * 1024 * 1024),
    )(x_btc, *weights)

    # TODO(synk): for production sizes (large T or many layers) tile the T axis
    # with a receptive-field halo and stream per-layer weights via an
    # "arbitrary" grid axis so the working set fits v7x's 64 MiB VMEM.
    return jnp.transpose(out_padded[:, :, :O], (0, 2, 1))            # (B, O, T)


# ------------------------- Pure-JAX reference -------------------------------


def wavenet_reference(x_nct, params, *, blocks, dilation_depth):
    x = jnp.transpose(x_nct, (0, 2, 1)).astype(jnp.float32)  # (B, T, Cin)
    B, T, _ = x.shape

    def shift(h, d):
        pad = jnp.zeros((B, d, h.shape[-1]), h.dtype)
        return jnp.concatenate([pad, h[:, : T - d, :]], axis=1)

    h = shift(x, 1) @ params["w_in0"] + x @ params["w_in1"] + params["b_in"]
    skip_sum = 0.0
    l = 0
    for _blk in range(blocks):
        for depth in range(dilation_depth):
            d = 2 ** depth
            h_d = shift(h, d)
            f = jnp.tanh(h_d @ params["wf0"][l] + h @ params["wf1"][l] + params["bf"][l])
            g = jax.nn.sigmoid(h_d @ params["wg0"][l] + h @ params["wg1"][l] + params["bg"][l])
            fx = f * g
            fx = fx @ params["wr"][l] + params["br"][l]
            skip = fx @ params["ws"][l] + params["bs"][l]
            skip_sum = skip_sum + skip
            h = fx + h
            l += 1
    out = jnp.maximum(skip_sum, 0.0)
    out = jnp.maximum(out @ params["wo1"] + params["bo1"], 0.0)
    out = out @ params["wo2"] + params["bo2"]
    return jnp.transpose(out, (0, 2, 1))


# ------------------------------ Param init ----------------------------------


def init_params(key, input_size, out_size, residual_size, skip_size,
                blocks, dilation_depth):
    L = blocks * dilation_depth
    R, S, O = residual_size, skip_size, out_size
    ks = jax.random.split(key, 17)
    n = lambda k, shape: (0.1 * jax.random.normal(k, shape)).astype(jnp.float32)
    return {
        "w_in0": n(ks[0], (input_size, R)), "w_in1": n(ks[1], (input_size, R)),
        "b_in": n(ks[2], (1, R)),
        "wf0": n(ks[3], (L, R, R)), "wf1": n(ks[4], (L, R, R)), "bf": n(ks[5], (L, 1, R)),
        "wg0": n(ks[6], (L, R, R)), "wg1": n(ks[7], (L, R, R)), "bg": n(ks[8], (L, 1, R)),
        "wr": n(ks[9], (L, R, R)), "br": n(ks[10], (L, 1, R)),
        "ws": n(ks[11], (L, R, S)), "bs": n(ks[12], (L, 1, S)),
        "wo1": n(ks[13], (S, O)), "bo1": n(ks[14], (1, O)),
        "wo2": n(ks[15], (O, O)), "bo2": n(ks[16], (1, O)),
    }


# --------------------------------- Main --------------------------------------


if __name__ == "__main__":
    # Small WaveNet config
    B, T = 2, 16
    input_size, out_size = 4, 8
    residual_size, skip_size = 32, 32
    blocks, dilation_depth = 2, 3

    key = jax.random.PRNGKey(0)
    k_x, k_p = jax.random.split(key)
    x = jax.random.normal(k_x, (B, input_size, T), dtype=jnp.float32)  # (N, C, T)
    params = init_params(k_p, input_size, out_size, residual_size, skip_size,
                         blocks, dilation_depth)

    out = wavenet_forward(x, params, blocks=blocks, dilation_depth=dilation_depth)
    out = jax.block_until_ready(out)

    ref = wavenet_reference(x, params, blocks=blocks, dilation_depth=dilation_depth)
    np.testing.assert_allclose(np.asarray(out), np.asarray(ref), rtol=1e-4, atol=1e-4)

    assert out.shape == (B, out_size, T)
    print("KERNEL_OK")
</pallas_src>

<mosaic_0001>
module attributes {stable_mosaic.version = 11 : i64} {
  func.func @wavenet_kernel(%arg0: i32, %arg1: memref<2x16x4xf32, #tpu.memory_space<vmem>>, %arg2: memref<4x32xf32, #tpu.memory_space<vmem>>, %arg3: memref<4x32xf32, #tpu.memory_space<vmem>>, %arg4: memref<1x32xf32, #tpu.memory_space<vmem>>, %arg5: memref<6x32x64xf32, #tpu.memory_space<vmem>>, %arg6: memref<6x32x64xf32, #tpu.memory_space<vmem>>, %arg7: memref<6x1x64xf32, #tpu.memory_space<vmem>>, %arg8: memref<6x32x64xf32, #tpu.memory_space<vmem>>, %arg9: memref<6x1x64xf32, #tpu.memory_space<vmem>>, %arg10: memref<32x8xf32, #tpu.memory_space<vmem>>, %arg11: memref<1x8xf32, #tpu.memory_space<vmem>>, %arg12: memref<8x128xf32, #tpu.memory_space<vmem>>, %arg13: memref<1x128xf32, #tpu.memory_space<vmem>>, %arg14: memref<2x16x128xf32, #tpu.memory_space<vmem>>) attributes {dimension_semantics = [#tpu.dimension_semantics<parallel>], iteration_bounds = array<i64: 1>, scalar_prefetch = 0 : i64, scratch_operands = 0 : i64, tpu.core_type = #tpu.core_type<tc>, window_params = [{transform_indices = @transform_0, window_bounds = array<i64: 2, 16, 4>}, {pipeline_mode = #tpu.pipeline_mode<synchronous>, transform_indices = @transform_1, window_bounds = array<i64: 4, 32>}, {pipeline_mode = #tpu.pipeline_mode<synchronous>, transform_indices = @transform_2, window_bounds = array<i64: 4, 32>}, {pipeline_mode = #tpu.pipeline_mode<synchronous>, transform_indices = @transform_3, window_bounds = array<i64: 1, 32>}, {pipeline_mode = #tpu.pipeline_mode<synchronous>, transform_indices = @transform_4, window_bounds = array<i64: 6, 32, 64>}, {pipeline_mode = #tpu.pipeline_mode<synchronous>, transform_indices = @transform_5, window_bounds = array<i64: 6, 32, 64>}, {pipeline_mode = #tpu.pipeline_mode<synchronous>, transform_indices = @transform_6, window_bounds = array<i64: 6, 1, 64>}, {pipeline_mode = #tpu.pipeline_mode<synchronous>, transform_indices = @transform_7, window_bounds = array<i64: 6, 32, 64>}, {pipeline_mode = #tpu.pipeline_mode<synchronous>, transform_indices = @transform_8, window_bounds = array<i64: 6, 1, 64>}, {pipeline_mode = #tpu.pipeline_mode<synchronous>, transform_indices = @transform_9, window_bounds = array<i64: 32, 8>}, {pipeline_mode = #tpu.pipeline_mode<synchronous>, transform_indices = @transform_10, window_bounds = array<i64: 1, 8>}, {pipeline_mode = #tpu.pipeline_mode<synchronous>, transform_indices = @transform_11, window_bounds = array<i64: 8, 128>}, {pipeline_mode = #tpu.pipeline_mode<synchronous>, transform_indices = @transform_12, window_bounds = array<i64: 1, 128>}, {transform_indices = @transform_13, window_bounds = array<i64: 2, 16, 128>}]} {
    %c0 = arith.constant 0 : index
    %c0_0 = arith.constant 0 : index
    %c0_1 = arith.constant 0 : index
    %0 = vector.load %arg1[%c0, %c0_0, %c0_1] : memref<2x16x4xf32, #tpu.memory_space<vmem>>, vector<2x16x4xf32>
    %1 = vector.shape_cast %0 : vector<2x16x4xf32> to vector<32x4xf32>
    %2 = tpu.iota {dimensions = array<i32: 0>} : vector<32x1xi32>
    %c16_i32 = arith.constant 16 : i32
    %c0_i32 = arith.constant 0 : i32
    %3 = arith.cmpi eq, %c16_i32, %c0_i32 : i32
    %c1_i32 = arith.constant 1 : i32
    %4 = arith.select %3, %c1_i32, %c16_i32 : i32
    %5 = vector.broadcast %4 : i32 to vector<32x1xi32>
    %6 = arith.remsi %2, %5 : vector<32x1xi32>
    %c0_i32_2 = arith.constant 0 : i32
    %7 = vector.broadcast %c0_i32_2 : i32 to vector<32x1xi32>
    %8 = arith.cmpi ne, %6, %7 : vector<32x1xi32>
    %c0_i32_3 = arith.constant 0 : i32
    %9 = vector.broadcast %c0_i32_3 : i32 to vector<32x1xi32>
    %10 = arith.cmpi slt, %6, %9 : vector<32x1xi32>
    %c0_i32_4 = arith.constant 0 : i32
    %11 = arith.cmpi slt, %4, %c0_i32_4 : i32
    %12 = vector.broadcast %11 : i1 to vector<32x1xi1>
    %13 = vector.broadcast %12 : vector<32x1xi1> to vector<32x1xi1>
    %14 = arith.xori %10, %13 : vector<32x1xi1>
    %15 = arith.andi %14, %8 : vector<32x1xi1>
    %16 = vector.broadcast %4 : i32 to vector<32x1xi32>
    %17 = arith.addi %6, %16 : vector<32x1xi32>
    %18 = arith.select %15, %17, %6 : vector<32x1xi1>, vector<32x1xi32>
    %c1_i32_5 = arith.constant 1 : i32
    %19 = vector.broadcast %c1_i32_5 : i32 to vector<32x1xi32>
    %20 = arith.cmpi slt, %18, %19 : vector<32x1xi32>
    %c2_i32 = arith.constant 2 : i32
    %21 = vector.broadcast %c2_i32 : i32 to vector<32x1xi32>
    %22 = arith.cmpi slt, %18, %21 : vector<32x1xi32>
    %c4_i32 = arith.constant 4 : i32
    %23 = vector.broadcast %c4_i32 : i32 to vector<32x1xi32>
    %24 = arith.cmpi slt, %18, %23 : vector<32x1xi32>
    %c1_i32_6 = arith.constant 1 : i32
    %25 = tpu.dynamic_rotate %1 by %c1_i32_6 dim 0 : vector<32x4xf32>, i32 -> vector<32x4xf32>
    %cst = arith.constant 0.000000e+00 : f32
    %26 = vector.shape_cast %20 : vector<32x1xi1> to vector<32x1xi1>
    %27 = vector.broadcast %26 : vector<32x1xi1> to vector<32x4xi1>
    %28 = vector.broadcast %cst : f32 to vector<32x4xf32>
    %29 = arith.select %27, %28, %25 : vector<32x4xi1>, vector<32x4xf32>
    %c0_7 = arith.constant 0 : index
    %c0_8 = arith.constant 0 : index
    %30 = vector.load %arg2[%c0_7, %c0_8] : memref<4x32xf32, #tpu.memory_space<vmem>>, vector<4x32xf32>
    %cst_9 = arith.constant dense<0.000000e+00> : vector<32x32xf32>
    %31 = tpu.matmul %29, %30, %cst_9 {dimension_numbers = #tpu.dot_dimension_numbers<[1], [0], [0], [1], [0, 0, 1, 1], [], []>} : vector<32x4xf32>, vector<4x32xf32>, vector<32x32xf32> -> vector<32x32xf32>
    %c0_10 = arith.constant 0 : index
    %c0_11 = arith.constant 0 : index
    %32 = vector.load %arg3[%c0_10, %c0_11] : memref<4x32xf32, #tpu.memory_space<vmem>>, vector<4x32xf32>
    %cst_12 = arith.constant dense<0.000000e+00> : vector<32x32xf32>
    %33 = tpu.matmul %1, %32, %cst_12 {dimension_numbers = #tpu.dot_dimension_numbers<[1], [0], [0], [1], [0, 0, 1, 1], [], []>} : vector<32x4xf32>, vector<4x32xf32>, vector<32x32xf32> -> vector<32x32xf32>
    %34 = arith.addf %31, %33 : vector<32x32xf32>
    %c0_13 = arith.constant 0 : index
    %c0_14 = arith.constant 0 : index
    %35 = vector.load %arg4[%c0_13, %c0_14] : memref<1x32xf32, #tpu.memory_space<vmem>>, vector<1x32xf32>
    %36 = vector.broadcast %35 : vector<1x32xf32> to vector<32x32xf32>
    %37 = arith.addf %34, %36 : vector<32x32xf32>
    %cst_15 = arith.constant 0.000000e+00 : f32
    %38 = vector.broadcast %cst_15 : f32 to vector<32x32xf32>
    %c1_i32_16 = arith.constant 1 : i32
    %39 = tpu.dynamic_rotate %37 by %c1_i32_16 dim 0 : vector<32x32xf32>, i32 -> vector<32x32xf32>
    %cst_17 = arith.constant 0.000000e+00 : f32
    %40 = vector.shape_cast %20 : vector<32x1xi1> to vector<32x1xi1>
    %41 = vector.broadcast %40 : vector<32x1xi1> to vector<32x32xi1>
    %42 = vector.broadcast %cst_17 : f32 to vector<32x32xf32>
    %43 = arith.select %41, %42, %39 : vector<32x32xi1>, vector<32x32xf32>
    %c0_18 = arith.constant 0 : index
    %c0_19 = arith.constant 0 : index
    %c0_20 = arith.constant 0 : index
    %44 = vector.load %arg5[%c0_18, %c0_19, %c0_20] : memref<6x32x64xf32, #tpu.memory_space<vmem>>, vector<1x32x64xf32>
    %45 = vector.shape_cast %44 : vector<1x32x64xf32> to vector<32x64xf32>
    %cst_21 = arith.constant dense<0.000000e+00> : vector<32x64xf32>
    %46 = tpu.matmul %43, %45, %cst_21 {dimension_numbers = #tpu.dot_dimension_numbers<[1], [0], [0], [1], [0, 0, 1, 1], [], []>} : vector<32x32xf32>, vector<32x64xf32>, vector<32x64xf32> -> vector<32x64xf32>
    %c0_22 = arith.constant 0 : index
    %c0_23 = arith.constant 0 : index
    %c0_24 = arith.constant 0 : index
    %47 = vector.load %arg6[%c0_22, %c0_23, %c0_24] : memref<6x32x64xf32, #tpu.memory_space<vmem>>, vector<1x32x64xf32>
    %48 = vector.shape_cast %47 : vector<1x32x64xf32> to vector<32x64xf32>
    %cst_25 = arith.constant dense<0.000000e+00> : vector<32x64xf32>
    %49 = tpu.matmul %37, %48, %cst_25 {dimension_numbers = #tpu.dot_dimension_numbers<[1], [0], [0], [1], [0, 0, 1, 1], [], []>} : vector<32x32xf32>, vector<32x64xf32>, vector<32x64xf32> -> vector<32x64xf32>
    %50 = arith.addf %46, %49 : vector<32x64xf32>
    %c0_26 = arith.constant 0 : index
    %c0_27 = arith.constant 0 : index
    %c0_28 = arith.constant 0 : index
    %51 = vector.load %arg7[%c0_26, %c0_27, %c0_28] : memref<6x1x64xf32, #tpu.memory_space<vmem>>, vector<1x1x64xf32>
    %52 = vector.shape_cast %51 : vector<1x1x64xf32> to vector<1x64xf32>
    %53 = vector.broadcast %52 : vector<1x64xf32> to vector<32x64xf32>
    %54 = arith.addf %50, %53 : vector<32x64xf32>
    %55 = vector.extract_strided_slice %54 {offsets = [0, 0], sizes = [32, 32], strides = [1, 1]} : vector<32x64xf32> to vector<32x32xf32>
    %56 = math.tanh %55 : vector<32x32xf32>
    %57 = vector.extract_strided_slice %54 {offsets = [0, 32], sizes = [32, 32], strides = [1, 1]} : vector<32x64xf32> to vector<32x32xf32>
    %58 = arith.negf %57 : vector<32x32xf32>
    %59 = math.exp %58 : vector<32x32xf32>
    %cst_29 = arith.constant 1.000000e+00 : f32
    %60 = vector.broadcast %cst_29 : f32 to vector<32x32xf32>
    %61 = arith.addf %60, %59 : vector<32x32xf32>
    %62 = arith.divf %60, %61 : vector<32x32xf32>
    %63 = arith.mulf %56, %62 : vector<32x32xf32>
    %c0_30 = arith.constant 0 : index
    %c0_31 = arith.constant 0 : index
    %c0_32 = arith.constant 0 : index
    %64 = vector.load %arg8[%c0_30, %c0_31, %c0_32] : memref<6x32x64xf32, #tpu.memory_space<vmem>>, vector<1x32x64xf32>
    %65 = vector.shape_cast %64 : vector<1x32x64xf32> to vector<32x64xf32>
    %cst_33 = arith.constant dense<0.000000e+00> : vector<32x64xf32>
    %66 = tpu.matmul %63, %65, %cst_33 {dimension_numbers = #tpu.dot_dimension_numbers<[1], [0], [0], [1], [0, 0, 1, 1], [], []>} : vector<32x32xf32>, vector<32x64xf32>, vector<32x64xf32> -> vector<32x64xf32>
    %c0_34 = arith.constant 0 : index
    %c0_35 = arith.constant 0 : index
    %c0_36 = arith.constant 0 : index
    %67 = vector.load %arg9[%c0_34, %c0_35, %c0_36] : memref<6x1x64xf32, #tpu.memory_space<vmem>>, vector<1x1x64xf32>
    %68 = vector.shape_cast %67 : vector<1x1x64xf32> to vector<1x64xf32>
    %69 = vector.broadcast %68 : vector<1x64xf32> to vector<32x64xf32>
    %70 = arith.addf %66, %69 : vector<32x64xf32>
    %71 = vector.extract_strided_slice %70 {offsets = [0, 0], sizes = [32, 32], strides = [1, 1]} : vector<32x64xf32> to vector<32x32xf32>
    %72 = arith.addf %37, %71 : vector<32x32xf32>
    %73 = vector.extract_strided_slice %70 {offsets = [0, 32], sizes = [32, 32], strides = [1, 1]} : vector<32x64xf32> to vector<32x32xf32>
    %74 = arith.addf %38, %73 : vector<32x32xf32>
    %c2_i32_37 = arith.constant 2 : i32
    %75 = tpu.dynamic_rotate %72 by %c2_i32_37 dim 0 : vector<32x32xf32>, i32 -> vector<32x32xf32>
    %cst_38 = arith.constant 0.000000e+00 : f32
    %76 = vector.shape_cast %22 : vector<32x1xi1> to vector<32x1xi1>
    %77 = vector.broadcast %76 : vector<32x1xi1> to vector<32x32xi1>
    %78 = vector.broadcast %cst_38 : f32 to vector<32x32xf32>
    %79 = arith.select %77, %78, %75 : vector<32x32xi1>, vector<32x32xf32>
    %c1 = arith.constant 1 : index
    %c0_39 = arith.constant 0 : index
    %c0_40 = arith.constant 0 : index
    %80 = vector.load %arg5[%c1, %c0_39, %c0_40] : memref<6x32x64xf32, #tpu.memory_space<vmem>>, vector<1x32x64xf32>
    %81 = vector.shape_cast %80 : vector<1x32x64xf32> to vector<32x64xf32>
    %cst_41 = arith.constant dense<0.000000e+00> : vector<32x64xf32>
    %82 = tpu.matmul %79, %81, %cst_41 {dimension_numbers = #tpu.dot_dimension_numbers<[1], [0], [0], [1], [0, 0, 1, 1], [], []>} : vector<32x32xf32>, vector<32x64xf32>, vector<32x64xf32> -> vector<32x64xf32>
    %c1_42 = arith.constant 1 : index
    %c0_43 = arith.constant 0 : index
    %c0_44 = arith.constant 0 : index
    %83 = vector.load %arg6[%c1_42, %c0_43, %c0_44] : memref<6x32x64xf32, #tpu.memory_space<vmem>>, vector<1x32x64xf32>
    %84 = vector.shape_cast %83 : vector<1x32x64xf32> to vector<32x64xf32>
    %cst_45 = arith.constant dense<0.000000e+00> : vector<32x64xf32>
    %85 = tpu.matmul %72, %84, %cst_45 {dimension_numbers = #tpu.dot_dimension_numbers<[1], [0], [0], [1], [0, 0, 1, 1], [], []>} : vector<32x32xf32>, vector<32x64xf32>, vector<32x64xf32> -> vector<32x64xf32>
    %86 = arith.addf %82, %85 : vector<32x64xf32>
    %c1_46 = arith.constant 1 : index
    %c0_47 = arith.constant 0 : index
    %c0_48 = arith.constant 0 : index
    %87 = vector.load %arg7[%c1_46, %c0_47, %c0_48] : memref<6x1x64xf32, #tpu.memory_space<vmem>>, vector<1x1x64xf32>
    %88 = vector.shape_cast %87 : vector<1x1x64xf32> to vector<1x64xf32>
    %89 = vector.broadcast %88 : vector<1x64xf32> to vector<32x64xf32>
    %90 = arith.addf %86, %89 : vector<32x64xf32>
    %91 = vector.extract_strided_slice %90 {offsets = [0, 0], sizes = [32, 32], strides = [1, 1]} : vector<32x64xf32> to vector<32x32xf32>
    %92 = math.tanh %91 : vector<32x32xf32>
    %93 = vector.extract_strided_slice %90 {offsets = [0, 32], sizes = [32, 32], strides = [1, 1]} : vector<32x64xf32> to vector<32x32xf32>
    %94 = arith.negf %93 : vector<32x32xf32>
    %95 = math.exp %94 : vector<32x32xf32>
    %cst_49 = arith.constant 1.000000e+00 : f32
    %96 = vector.broadcast %cst_49 : f32 to vector<32x32xf32>
    %97 = arith.addf %96, %95 : vector<32x32xf32>
    %98 = arith.divf %96, %97 : vector<32x32xf32>
    %99 = arith.mulf %92, %98 : vector<32x32xf32>
    %c1_50 = arith.constant 1 : index
    %c0_51 = arith.constant 0 : index
    %c0_52 = arith.constant 0 : index
    %100 = vector.load %arg8[%c1_50, %c0_51, %c0_52] : memref<6x32x64xf32, #tpu.memory_space<vmem>>, vector<1x32x64xf32>
    %101 = vector.shape_cast %100 : vector<1x32x64xf32> to vector<32x64xf32>
    %cst_53 = arith.constant dense<0.000000e+00> : vector<32x64xf32>
    %102 = tpu.matmul %99, %101, %cst_53 {dimension_numbers = #tpu.dot_dimension_numbers<[1], [0], [0], [1], [0, 0, 1, 1], [], []>} : vector<32x32xf32>, vector<32x64xf32>, vector<32x64xf32> -> vector<32x64xf32>
    %c1_54 = arith.constant 1 : index
    %c0_55 = arith.constant 0 : index
    %c0_56 = arith.constant 0 : index
    %103 = vector.load %arg9[%c1_54, %c0_55, %c0_56] : memref<6x1x64xf32, #tpu.memory_space<vmem>>, vector<1x1x64xf32>
    %104 = vector.shape_cast %103 : vector<1x1x64xf32> to vector<1x64xf32>
    %105 = vector.broadcast %104 : vector<1x64xf32> to vector<32x64xf32>
    %106 = arith.addf %102, %105 : vector<32x64xf32>
    %107 = vector.extract_strided_slice %106 {offsets = [0, 0], sizes = [32, 32], strides = [1, 1]} : vector<32x64xf32> to vector<32x32xf32>
    %108 = arith.addf %72, %107 : vector<32x32xf32>
    %109 = vector.extract_strided_slice %106 {offsets = [0, 32], sizes = [32, 32], strides = [1, 1]} : vector<32x64xf32> to vector<32x32xf32>
    %110 = arith.addf %74, %109 : vector<32x32xf32>
    %c4_i32_57 = arith.constant 4 : i32
    %111 = tpu.dynamic_rotate %108 by %c4_i32_57 dim 0 : vector<32x32xf32>, i32 -> vector<32x32xf32>
    %cst_58 = arith.constant 0.000000e+00 : f32
    %112 = vector.shape_cast %24 : vector<32x1xi1> to vector<32x1xi1>
    %113 = vector.broadcast %112 : vector<32x1xi1> to vector<32x32xi1>
    %114 = vector.broadcast %cst_58 : f32 to vector<32x32xf32>
    %115 = arith.select %113, %114, %111 : vector<32x32xi1>, vector<32x32xf32>
    %c2 = arith.constant 2 : index
    %c0_59 = arith.constant 0 : index
    %c0_60 = arith.constant 0 : index
    %116 = vector.load %arg5[%c2, %c0_59, %c0_60] : memref<6x32x64xf32, #tpu.memory_space<vmem>>, vector<1x32x64xf32>
    %117 = vector.shape_cast %116 : vector<1x32x64xf32> to vector<32x64xf32>
    %cst_61 = arith.constant dense<0.000000e+00> : vector<32x64xf32>
    %118 = tpu.matmul %115, %117, %cst_61 {dimension_numbers = #tpu.dot_dimension_numbers<[1], [0], [0], [1], [0, 0, 1, 1], [], []>} : vector<32x32xf32>, vector<32x64xf32>, vector<32x64xf32> -> vector<32x64xf32>
    %c2_62 = arith.constant 2 : index
    %c0_63 = arith.constant 0 : index
    %c0_64 = arith.constant 0 : index
    %119 = vector.load %arg6[%c2_62, %c0_63, %c0_64] : memref<6x32x64xf32, #tpu.memory_space<vmem>>, vector<1x32x64xf32>
    %120 = vector.shape_cast %119 : vector<1x32x64xf32> to vector<32x64xf32>
    %cst_65 = arith.constant dense<0.000000e+00> : vector<32x64xf32>
    %121 = tpu.matmul %108, %120, %cst_65 {dimension_numbers = #tpu.dot_dimension_numbers<[1], [0], [0], [1], [0, 0, 1, 1], [], []>} : vector<32x32xf32>, vector<32x64xf32>, vector<32x64xf32> -> vector<32x64xf32>
    %122 = arith.addf %118, %121 : vector<32x64xf32>
    %c2_66 = arith.constant 2 : index
    %c0_67 = arith.constant 0 : index
    %c0_68 = arith.constant 0 : index
    %123 = vector.load %arg7[%c2_66, %c0_67, %c0_68] : memref<6x1x64xf32, #tpu.memory_space<vmem>>, vector<1x1x64xf32>
    %124 = vector.shape_cast %123 : vector<1x1x64xf32> to vector<1x64xf32>
    %125 = vector.broadcast %124 : vector<1x64xf32> to vector<32x64xf32>
    %126 = arith.addf %122, %125 : vector<32x64xf32>
    %127 = vector.extract_strided_slice %126 {offsets = [0, 0], sizes = [32, 32], strides = [1, 1]} : vector<32x64xf32> to vector<32x32xf32>
    %128 = math.tanh %127 : vector<32x32xf32>
    %129 = vector.extract_strided_slice %126 {offsets = [0, 32], sizes = [32, 32], strides = [1, 1]} : vector<32x64xf32> to vector<32x32xf32>
    %130 = arith.negf %129 : vector<32x32xf32>
    %131 = math.exp %130 : vector<32x32xf32>
    %cst_69 = arith.constant 1.000000e+00 : f32
    %132 = vector.broadcast %cst_69 : f32 to vector<32x32xf32>
    %133 = arith.addf %132, %131 : vector<32x32xf32>
    %134 = arith.divf %132, %133 : vector<32x32xf32>
    %135 = arith.mulf %128, %134 : vector<32x32xf32>
    %c2_70 = arith.constant 2 : index
    %c0_71 = arith.constant 0 : index
    %c0_72 = arith.constant 0 : index
    %136 = vector.load %arg8[%c2_70, %c0_71, %c0_72] : memref<6x32x64xf32, #tpu.memory_space<vmem>>, vector<1x32x64xf32>
    %137 = vector.shape_cast %136 : vector<1x32x64xf32> to vector<32x64xf32>
    %cst_73 = arith.constant dense<0.000000e+00> : vector<32x64xf32>
    %138 = tpu.matmul %135, %137, %cst_73 {dimension_numbers = #tpu.dot_dimension_numbers<[1], [0], [0], [1], [0, 0, 1, 1], [], []>} : vector<32x32xf32>, vector<32x64xf32>, vector<32x64xf32> -> vector<32x64xf32>
    %c2_74 = arith.constant 2 : index
    %c0_75 = arith.constant 0 : index
    %c0_76 = arith.constant 0 : index
    %139 = vector.load %arg9[%c2_74, %c0_75, %c0_76] : memref<6x1x64xf32, #tpu.memory_space<vmem>>, vector<1x1x64xf32>
    %140 = vector.shape_cast %139 : vector<1x1x64xf32> to vector<1x64xf32>
    %141 = vector.broadcast %140 : vector<1x64xf32> to vector<32x64xf32>
    %142 = arith.addf %138, %141 : vector<32x64xf32>
    %143 = vector.extract_strided_slice %142 {offsets = [0, 0], sizes = [32, 32], strides = [1, 1]} : vector<32x64xf32> to vector<32x32xf32>
    %144 = arith.addf %108, %143 : vector<32x32xf32>
    %145 = vector.extract_strided_slice %142 {offsets = [0, 32], sizes = [32, 32], strides = [1, 1]} : vector<32x64xf32> to vector<32x32xf32>
    %146 = arith.addf %110, %145 : vector<32x32xf32>
    %c1_i32_77 = arith.constant 1 : i32
    %147 = tpu.dynamic_rotate %144 by %c1_i32_77 dim 0 : vector<32x32xf32>, i32 -> vector<32x32xf32>
    %cst_78 = arith.constant 0.000000e+00 : f32
    %148 = vector.shape_cast %20 : vector<32x1xi1> to vector<32x1xi1>
    %149 = vector.broadcast %148 : vector<32x1xi1> to vector<32x32xi1>
    %150 = vector.broadcast %cst_78 : f32 to vector<32x32xf32>
    %151 = arith.select %149, %150, %147 : vector<32x32xi1>, vector<32x32xf32>
    %c3 = arith.constant 3 : index
    %c0_79 = arith.constant 0 : index
    %c0_80 = arith.constant 0 : index
    %152 = vector.load %arg5[%c3, %c0_79, %c0_80] : memref<6x32x64xf32, #tpu.memory_space<vmem>>, vector<1x32x64xf32>
    %153 = vector.shape_cast %152 : vector<1x32x64xf32> to vector<32x64xf32>
    %cst_81 = arith.constant dense<0.000000e+00> : vector<32x64xf32>
    %154 = tpu.matmul %151, %153, %cst_81 {dimension_numbers = #tpu.dot_dimension_numbers<[1], [0], [0], [1], [0, 0, 1, 1], [], []>} : vector<32x32xf32>, vector<32x64xf32>, vector<32x64xf32> -> vector<32x64xf32>
    %c3_82 = arith.constant 3 : index
    %c0_83 = arith.constant 0 : index
    %c0_84 = arith.constant 0 : index
    %155 = vector.load %arg6[%c3_82, %c0_83, %c0_84] : memref<6x32x64xf32, #tpu.memory_space<vmem>>, vector<1x32x64xf32>
    %156 = vector.shape_cast %155 : vector<1x32x64xf32> to vector<32x64xf32>
    %cst_85 = arith.constant dense<0.000000e+00> : vector<32x64xf32>
    %157 = tpu.matmul %144, %156, %cst_85 {dimension_numbers = #tpu.dot_dimension_numbers<[1], [0], [0], [1], [0, 0, 1, 1], [], []>} : vector<32x32xf32>, vector<32x64xf32>, vector<32x64xf32> -> vector<32x64xf32>
    %158 = arith.addf %154, %157 : vector<32x64xf32>
    %c3_86 = arith.constant 3 : index
    %c0_87 = arith.constant 0 : index
    %c0_88 = arith.constant 0 : index
    %159 = vector.load %arg7[%c3_86, %c0_87, %c0_88] : memref<6x1x64xf32, #tpu.memory_space<vmem>>, vector<1x1x64xf32>
    %160 = vector.shape_cast %159 : vector<1x1x64xf32> to vector<1x64xf32>
    %161 = vector.broadcast %160 : vector<1x64xf32> to vector<32x64xf32>
    %162 = arith.addf %158, %161 : vector<32x64xf32>
    %163 = vector.extract_strided_slice %162 {offsets = [0, 0], sizes = [32, 32], strides = [1, 1]} : vector<32x64xf32> to vector<32x32xf32>
    %164 = math.tanh %163 : vector<32x32xf32>
    %165 = vector.extract_strided_slice %162 {offsets = [0, 32], sizes = [32, 32], strides = [1, 1]} : vector<32x64xf32> to vector<32x32xf32>
    %166 = arith.negf %165 : vector<32x32xf32>
    %167 = math.exp %166 : vector<32x32xf32>
    %cst_89 = arith.constant 1.000000e+00 : f32
    %168 = vector.broadcast %cst_89 : f32 to vector<32x32xf32>
    %169 = arith.addf %168, %167 : vector<32x32xf32>
    %170 = arith.divf %168, %169 : vector<32x32xf32>
    %171 = arith.mulf %164, %170 : vector<32x32xf32>
    %c3_90 = arith.constant 3 : index
    %c0_91 = arith.constant 0 : index
    %c0_92 = arith.constant 0 : index
    %172 = vector.load %arg8[%c3_90, %c0_91, %c0_92] : memref<6x32x64xf32, #tpu.memory_space<vmem>>, vector<1x32x64xf32>
    %173 = vector.shape_cast %172 : vector<1x32x64xf32> to vector<32x64xf32>
    %cst_93 = arith.constant dense<0.000000e+00> : vector<32x64xf32>
    %174 = tpu.matmul %171, %173, %cst_93 {dimension_numbers = #tpu.dot_dimension_numbers<[1], [0], [0], [1], [0, 0, 1, 1], [], []>} : vector<32x32xf32>, vector<32x64xf32>, vector<32x64xf32> -> vector<32x64xf32>
    %c3_94 = arith.constant 3 : index
    %c0_95 = arith.constant 0 : index
    %c0_96 = arith.constant 0 : index
    %175 = vector.load %arg9[%c3_94, %c0_95, %c0_96] : memref<6x1x64xf32, #tpu.memory_space<vmem>>, vector<1x1x64xf32>
    %176 = vector.shape_cast %175 : vector<1x1x64xf32> to vector<1x64xf32>
    %177 = vector.broadcast %176 : vector<1x64xf32> to vector<32x64xf32>
    %178 = arith.addf %174, %177 : vector<32x64xf32>
    %179 = vector.extract_strided_slice %178 {offsets = [0, 0], sizes = [32, 32], strides = [1, 1]} : vector<32x64xf32> to vector<32x32xf32>
    %180 = arith.addf %144, %179 : vector<32x32xf32>
    %181 = vector.extract_strided_slice %178 {offsets = [0, 32], sizes = [32, 32], strides = [1, 1]} : vector<32x64xf32> to vector<32x32xf32>
    %182 = arith.addf %146, %181 : vector<32x32xf32>
    %c2_i32_97 = arith.constant 2 : i32
    %183 = tpu.dynamic_rotate %180 by %c2_i32_97 dim 0 : vector<32x32xf32>, i32 -> vector<32x32xf32>
    %cst_98 = arith.constant 0.000000e+00 : f32
    %184 = vector.shape_cast %22 : vector<32x1xi1> to vector<32x1xi1>
    %185 = vector.broadcast %184 : vector<32x1xi1> to vector<32x32xi1>
    %186 = vector.broadcast %cst_98 : f32 to vector<32x32xf32>
    %187 = arith.select %185, %186, %183 : vector<32x32xi1>, vector<32x32xf32>
    %c4 = arith.constant 4 : index
    %c0_99 = arith.constant 0 : index
    %c0_100 = arith.constant 0 : index
    %188 = vector.load %arg5[%c4, %c0_99, %c0_100] : memref<6x32x64xf32, #tpu.memory_space<vmem>>, vector<1x32x64xf32>
    %189 = vector.shape_cast %188 : vector<1x32x64xf32> to vector<32x64xf32>
    %cst_101 = arith.constant dense<0.000000e+00> : vector<32x64xf32>
    %190 = tpu.matmul %187, %189, %cst_101 {dimension_numbers = #tpu.dot_dimension_numbers<[1], [0], [0], [1], [0, 0, 1, 1], [], []>} : vector<32x32xf32>, vector<32x64xf32>, vector<32x64xf32> -> vector<32x64xf32>
    %c4_102 = arith.constant 4 : index
    %c0_103 = arith.constant 0 : index
    %c0_104 = arith.constant 0 : index
    %191 = vector.load %arg6[%c4_102, %c0_103, %c0_104] : memref<6x32x64xf32, #tpu.memory_space<vmem>>, vector<1x32x64xf32>
    %192 = vector.shape_cast %191 : vector<1x32x64xf32> to vector<32x64xf32>
    %cst_105 = arith.constant dense<0.000000e+00> : vector<32x64xf32>
    %193 = tpu.matmul %180, %192, %cst_105 {dimension_numbers = #tpu.dot_dimension_numbers<[1], [0], [0], [1], [0, 0, 1, 1], [], []>} : vector<32x32xf32>, vector<32x64xf32>, vector<32x64xf32> -> vector<32x64xf32>
    %194 = arith.addf %190, %193 : vector<32x64xf32>
    %c4_106 = arith.constant 4 : index
    %c0_107 = arith.constant 0 : index
    %c0_108 = arith.constant 0 : index
    %195 = vector.load %arg7[%c4_106, %c0_107, %c0_108] : memref<6x1x64xf32, #tpu.memory_space<vmem>>, vector<1x1x64xf32>
    %196 = vector.shape_cast %195 : vector<1x1x64xf32> to vector<1x64xf32>
    %197 = vector.broadcast %196 : vector<1x64xf32> to vector<32x64xf32>
    %198 = arith.addf %194, %197 : vector<32x64xf32>
    %199 = vector.extract_strided_slice %198 {offsets = [0, 0], sizes = [32, 32], strides = [1, 1]} : vector<32x64xf32> to vector<32x32xf32>
    %200 = math.tanh %199 : vector<32x32xf32>
    %201 = vector.extract_strided_slice %198 {offsets = [0, 32], sizes = [32, 32], strides = [1, 1]} : vector<32x64xf32> to vector<32x32xf32>
    %202 = arith.negf %201 : vector<32x32xf32>
    %203 = math.exp %202 : vector<32x32xf32>
    %cst_109 = arith.constant 1.000000e+00 : f32
    %204 = vector.broadcast %cst_109 : f32 to vector<32x32xf32>
    %205 = arith.addf %204, %203 : vector<32x32xf32>
    %206 = arith.divf %204, %205 : vector<32x32xf32>
    %207 = arith.mulf %200, %206 : vector<32x32xf32>
    %c4_110 = arith.constant 4 : index
    %c0_111 = arith.constant 0 : index
    %c0_112 = arith.constant 0 : index
    %208 = vector.load %arg8[%c4_110, %c0_111, %c0_112] : memref<6x32x64xf32, #tpu.memory_space<vmem>>, vector<1x32x64xf32>
    %209 = vector.shape_cast %208 : vector<1x32x64xf32> to vector<32x64xf32>
    %cst_113 = arith.constant dense<0.000000e+00> : vector<32x64xf32>
    %210 = tpu.matmul %207, %209, %cst_113 {dimension_numbers = #tpu.dot_dimension_numbers<[1], [0], [0], [1], [0, 0, 1, 1], [], []>} : vector<32x32xf32>, vector<32x64xf32>, vector<32x64xf32> -> vector<32x64xf32>
    %c4_114 = arith.constant 4 : index
    %c0_115 = arith.constant 0 : index
    %c0_116 = arith.constant 0 : index
    %211 = vector.load %arg9[%c4_114, %c0_115, %c0_116] : memref<6x1x64xf32, #tpu.memory_space<vmem>>, vector<1x1x64xf32>
    %212 = vector.shape_cast %211 : vector<1x1x64xf32> to vector<1x64xf32>
    %213 = vector.broadcast %212 : vector<1x64xf32> to vector<32x64xf32>
    %214 = arith.addf %210, %213 : vector<32x64xf32>
    %215 = vector.extract_strided_slice %214 {offsets = [0, 0], sizes = [32, 32], strides = [1, 1]} : vector<32x64xf32> to vector<32x32xf32>
    %216 = arith.addf %180, %215 : vector<32x32xf32>
    %217 = vector.extract_strided_slice %214 {offsets = [0, 32], sizes = [32, 32], strides = [1, 1]} : vector<32x64xf32> to vector<32x32xf32>
    %218 = arith.addf %182, %217 : vector<32x32xf32>
    %c4_i32_117 = arith.constant 4 : i32
    %219 = tpu.dynamic_rotate %216 by %c4_i32_117 dim 0 : vector<32x32xf32>, i32 -> vector<32x32xf32>
    %cst_118 = arith.constant 0.000000e+00 : f32
    %220 = vector.shape_cast %24 : vector<32x1xi1> to vector<32x1xi1>
    %221 = vector.broadcast %220 : vector<32x1xi1> to vector<32x32xi1>
    %222 = vector.broadcast %cst_118 : f32 to vector<32x32xf32>
    %223 = arith.select %221, %222, %219 : vector<32x32xi1>, vector<32x32xf32>
    %c5 = arith.constant 5 : index
    %c0_119 = arith.constant 0 : index
    %c0_120 = arith.constant 0 : index
    %224 = vector.load %arg5[%c5, %c0_119, %c0_120] : memref<6x32x64xf32, #tpu.memory_space<vmem>>, vector<1x32x64xf32>
    %225 = vector.shape_cast %224 : vector<1x32x64xf32> to vector<32x64xf32>
    %cst_121 = arith.constant dense<0.000000e+00> : vector<32x64xf32>
    %226 = tpu.matmul %223, %225, %cst_121 {dimension_numbers = #tpu.dot_dimension_numbers<[1], [0], [0], [1], [0, 0, 1, 1], [], []>} : vector<32x32xf32>, vector<32x64xf32>, vector<32x64xf32> -> vector<32x64xf32>
    %c5_122 = arith.constant 5 : index
    %c0_123 = arith.constant 0 : index
    %c0_124 = arith.constant 0 : index
    %227 = vector.load %arg6[%c5_122, %c0_123, %c0_124] : memref<6x32x64xf32, #tpu.memory_space<vmem>>, vector<1x32x64xf32>
    %228 = vector.shape_cast %227 : vector<1x32x64xf32> to vector<32x64xf32>
    %cst_125 = arith.constant dense<0.000000e+00> : vector<32x64xf32>
    %229 = tpu.matmul %216, %228, %cst_125 {dimension_numbers = #tpu.dot_dimension_numbers<[1], [0], [0], [1], [0, 0, 1, 1], [], []>} : vector<32x32xf32>, vector<32x64xf32>, vector<32x64xf32> -> vector<32x64xf32>
    %230 = arith.addf %226, %229 : vector<32x64xf32>
    %c5_126 = arith.constant 5 : index
    %c0_127 = arith.constant 0 : index
    %c0_128 = arith.constant 0 : index
    %231 = vector.load %arg7[%c5_126, %c0_127, %c0_128] : memref<6x1x64xf32, #tpu.memory_space<vmem>>, vector<1x1x64xf32>
    %232 = vector.shape_cast %231 : vector<1x1x64xf32> to vector<1x64xf32>
    %233 = vector.broadcast %232 : vector<1x64xf32> to vector<32x64xf32>
    %234 = arith.addf %230, %233 : vector<32x64xf32>
    %235 = vector.extract_strided_slice %234 {offsets = [0, 0], sizes = [32, 32], strides = [1, 1]} : vector<32x64xf32> to vector<32x32xf32>
    %236 = math.tanh %235 : vector<32x32xf32>
    %237 = vector.extract_strided_slice %234 {offsets = [0, 32], sizes = [32, 32], strides = [1, 1]} : vector<32x64xf32> to vector<32x32xf32>
    %238 = arith.negf %237 : vector<32x32xf32>
    %239 = math.exp %238 : vector<32x32xf32>
    %cst_129 = arith.constant 1.000000e+00 : f32
    %240 = vector.broadcast %cst_129 : f32 to vector<32x32xf32>
    %241 = arith.addf %240, %239 : vector<32x32xf32>
    %242 = arith.divf %240, %241 : vector<32x32xf32>
    %243 = arith.mulf %236, %242 : vector<32x32xf32>
    %c5_130 = arith.constant 5 : index
    %c0_131 = arith.constant 0 : index
    %c0_132 = arith.constant 0 : index
    %244 = vector.load %arg8[%c5_130, %c0_131, %c0_132] : memref<6x32x64xf32, #tpu.memory_space<vmem>>, vector<1x32x64xf32>
    %245 = vector.shape_cast %244 : vector<1x32x64xf32> to vector<32x64xf32>
    %cst_133 = arith.constant dense<0.000000e+00> : vector<32x64xf32>
    %246 = tpu.matmul %243, %245, %cst_133 {dimension_numbers = #tpu.dot_dimension_numbers<[1], [0], [0], [1], [0, 0, 1, 1], [], []>} : vector<32x32xf32>, vector<32x64xf32>, vector<32x64xf32> -> vector<32x64xf32>
    %c5_134 = arith.constant 5 : index
    %c0_135 = arith.constant 0 : index
    %c0_136 = arith.constant 0 : index
    %247 = vector.load %arg9[%c5_134, %c0_135, %c0_136] : memref<6x1x64xf32, #tpu.memory_space<vmem>>, vector<1x1x64xf32>
    %248 = vector.shape_cast %247 : vector<1x1x64xf32> to vector<1x64xf32>
    %249 = vector.broadcast %248 : vector<1x64xf32> to vector<32x64xf32>
    %250 = arith.addf %246, %249 : vector<32x64xf32>
    %251 = vector.extract_strided_slice %250 {offsets = [0, 32], sizes = [32, 32], strides = [1, 1]} : vector<32x64xf32> to vector<32x32xf32>
    %252 = arith.addf %218, %251 : vector<32x32xf32>
    %cst_137 = arith.constant 0.000000e+00 : f32
    %253 = vector.broadcast %cst_137 : f32 to vector<32x32xf32>
    %254 = arith.maximumf %252, %253 : vector<32x32xf32>
    %c0_138 = arith.constant 0 : index
    %c0_139 = arith.constant 0 : index
    %255 = vector.load %arg10[%c0_138, %c0_139] : memref<32x8xf32, #tpu.memory_space<vmem>>, vector<32x8xf32>
    %cst_140 = arith.constant dense<0.000000e+00> : vector<32x8xf32>
    %256 = tpu.matmul %254, %255, %cst_140 {dimension_numbers = #tpu.dot_dimension_numbers<[1], [0], [0], [1], [0, 0, 1, 1], [], []>} : vector<32x32xf32>, vector<32x8xf32>, vector<32x8xf32> -> vector<32x8xf32>
    %c0_141 = arith.constant 0 : index
    %c0_142 = arith.constant 0 : index
    %257 = vector.load %arg11[%c0_141, %c0_142] : memref<1x8xf32, #tpu.memory_space<vmem>>, vector<1x8xf32>
    %258 = vector.broadcast %257 : vector<1x8xf32> to vector<32x8xf32>
    %259 = arith.addf %256, %258 : vector<32x8xf32>
    %cst_143 = arith.constant 0.000000e+00 : f32
    %260 = vector.broadcast %cst_143 : f32 to vector<32x8xf32>
    %261 = arith.maximumf %259, %260 : vector<32x8xf32>
    %c0_144 = arith.constant 0 : index
    %c0_145 = arith.constant 0 : index
    %262 = vector.load %arg12[%c0_144, %c0_145] : memref<8x128xf32, #tpu.memory_space<vmem>>, vector<8x128xf32>
    %cst_146 = arith.constant dense<0.000000e+00> : vector<32x128xf32>
    %263 = tpu.matmul %261, %262, %cst_146 {dimension_numbers = #tpu.dot_dimension_numbers<[1], [0], [0], [1], [0, 0, 1, 1], [], []>} : vector<32x8xf32>, vector<8x128xf32>, vector<32x128xf32> -> vector<32x128xf32>
    %c0_147 = arith.constant 0 : index
    %c0_148 = arith.constant 0 : index
    %264 = vector.load %arg13[%c0_147, %c0_148] : memref<1x128xf32, #tpu.memory_space<vmem>>, vector<1x128xf32>
    %265 = vector.broadcast %264 : vector<1x128xf32> to vector<32x128xf32>
    %266 = arith.addf %263, %265 : vector<32x128xf32>
    %267 = vector.shape_cast %266 : vector<32x128xf32> to vector<2x16x128xf32>
    %c0_149 = arith.constant 0 : index
    %c0_150 = arith.constant 0 : index
    %c0_151 = arith.constant 0 : index
    %268 = vector.load %arg14[%c0_149, %c0_150, %c0_151] : memref<2x16x128xf32, #tpu.memory_space<vmem>>, vector<2x16x128xf32>
    tpu.vector_store %arg14[%c0_149, %c0_150, %c0_151], %267 {strides = array<i32>} : memref<2x16x128xf32, #tpu.memory_space<vmem>>, vector<2x16x128xf32>,
    return
  }
  func.func @transform_0(%arg0: i32) -> (i32, i32, i32) {
    %c0_i32 = arith.constant 0 : i32
    %c0_i32_0 = arith.constant 0 : i32
    %c0_i32_1 = arith.constant 0 : i32
    return %arg0, %c0_i32, %c0_i32_0 : i32, i32, i32
  }
  func.func @transform_1(%arg0: i32) -> (i32, i32) {
    %c0_i32 = arith.constant 0 : i32
    %c0_i32_0 = arith.constant 0 : i32
    %c0_i32_1 = arith.constant 0 : i32
    return %c0_i32, %c0_i32_0 : i32, i32
  }
  func.func @transform_2(%arg0: i32) -> (i32, i32) {
    %c0_i32 = arith.constant 0 : i32
    %c0_i32_0 = arith.constant 0 : i32
    %c0_i32_1 = arith.constant 0 : i32
    return %c0_i32, %c0_i32_0 : i32, i32
  }
  func.func @transform_3(%arg0: i32) -> (i32, i32) {
    %c0_i32 = arith.constant 0 : i32
    %c0_i32_0 = arith.constant 0 : i32
    %c0_i32_1 = arith.constant 0 : i32
    return %c0_i32, %c0_i32_0 : i32, i32
  }
  func.func @transform_4(%arg0: i32) -> (i32, i32, i32) {
    %c0_i32 = arith.constant 0 : i32
    %c0_i32_0 = arith.constant 0 : i32
    %c0_i32_1 = arith.constant 0 : i32
    %c0_i32_2 = arith.constant 0 : i32
    return %c0_i32, %c0_i32_0, %c0_i32_1 : i32, i32, i32
  }
  func.func @transform_5(%arg0: i32) -> (i32, i32, i32) {
    %c0_i32 = arith.constant 0 : i32
    %c0_i32_0 = arith.constant 0 : i32
    %c0_i32_1 = arith.constant 0 : i32
    %c0_i32_2 = arith.constant 0 : i32
    return %c0_i32, %c0_i32_0, %c0_i32_1 : i32, i32, i32
  }
  func.func @transform_6(%arg0: i32) -> (i32, i32, i32) {
    %c0_i32 = arith.constant 0 : i32
    %c0_i32_0 = arith.constant 0 : i32
    %c0_i32_1 = arith.constant 0 : i32
    %c0_i32_2 = arith.constant 0 : i32
    return %c0_i32, %c0_i32_0, %c0_i32_1 : i32, i32, i32
  }
  func.func @transform_7(%arg0: i32) -> (i32, i32, i32) {
    %c0_i32 = arith.constant 0 : i32
    %c0_i32_0 = arith.constant 0 : i32
    %c0_i32_1 = arith.constant 0 : i32
    %c0_i32_2 = arith.constant 0 : i32
    return %c0_i32, %c0_i32_0, %c0_i32_1 : i32, i32, i32
  }
  func.func @transform_8(%arg0: i32) -> (i32, i32, i32) {
    %c0_i32 = arith.constant 0 : i32
    %c0_i32_0 = arith.constant 0 : i32
    %c0_i32_1 = arith.constant 0 : i32
    %c0_i32_2 = arith.constant 0 : i32
    return %c0_i32, %c0_i32_0, %c0_i32_1 : i32, i32, i32
  }
  func.func @transform_9(%arg0: i32) -> (i32, i32) {
    %c0_i32 = arith.constant 0 : i32
    %c0_i32_0 = arith.constant 0 : i32
    %c0_i32_1 = arith.constant 0 : i32
    return %c0_i32, %c0_i32_0 : i32, i32
  }
  func.func @transform_10(%arg0: i32) -> (i32, i32) {
    %c0_i32 = arith.constant 0 : i32
    %c0_i32_0 = arith.constant 0 : i32
    %c0_i32_1 = arith.constant 0 : i32
    return %c0_i32, %c0_i32_0 : i32, i32
  }
  func.func @transform_11(%arg0: i32) -> (i32, i32) {
    %c0_i32 = arith.constant 0 : i32
    %c0_i32_0 = arith.constant 0 : i32
    %c0_i32_1 = arith.constant 0 : i32
    return %c0_i32, %c0_i32_0 : i32, i32
  }
  func.func @transform_12(%arg0: i32) -> (i32, i32) {
    %c0_i32 = arith.constant 0 : i32
    %c0_i32_0 = arith.constant 0 : i32
    %c0_i32_1 = arith.constant 0 : i32
    return %c0_i32, %c0_i32_0 : i32, i32
  }
  func.func @transform_13(%arg0: i32) -> (i32, i32, i32) {
    %c0_i32 = arith.constant 0 : i32
    %c0_i32_0 = arith.constant 0 : i32
    %c0_i32_1 = arith.constant 0 : i32
    return %arg0, %c0_i32, %c0_i32_0 : i32, i32, i32
  }
}

</mosaic_0001>

<bundles_post_ra>
// kernel: tpu_custom_call.1
= control target key start
LH: loop header
LB: loop body
LE: loop exit
PB: predicated region body
PF: predicated region fallthrough
CT: control target
= control target key end

     0   :  { %18 = vsyncpa [#allocation3], 0  ;;  %s3114_s0 = inlined_call_operand.vmem [shape: f32[2,16,4], index: 0, kind: input, shape index: {}]   ;;  %s3115_s1 = inlined_call_operand.vmem [shape: f32[4,32], index: 1, kind: input, shape index: {}]   ;;  %s3116_s2 = inlined_call_operand.vmem [shape: f32[4,32], index: 2, kind: input, shape index: {}]   ;;  %s3117_s3 = inlined_call_operand.vmem [shape: f32[1,32], index: 3, kind: input, shape index: {}]   ;;  %s3118_s4 = inlined_call_operand.hbm [shape: f32[6,32,64], index: 4, kind: input, shape index: {}]   ;;  %s3119_s5 = inlined_call_operand.hbm [shape: f32[6,32,64], index: 5, kind: input, shape index: {}]   ;;  %s3120_s6 = inlined_call_operand.vmem [shape: f32[6,1,64], index: 6, kind: input, shape index: {}]   ;;  %s3121_s7 = inlined_call_operand.hbm [shape: f32[6,32,64], index: 7, kind: input, shape index: {}]   ;;  %s3122_s8 = inlined_call_operand.vmem [shape: f32[6,1,64], index: 8, kind: input, shape index: {}]   ;;  %s3123_s9 = inlined_call_operand.vmem [shape: f32[32,8], index: 9, kind: input, shape index: {}]   ;;  %s3124_s10 = inlined_call_operand.vmem [shape: f32[1,8], index: 10, kind: input, shape index: {}]   ;;  %s3125_s11 = inlined_call_operand.vmem [shape: f32[8,128], index: 11, kind: input, shape index: {}]   ;;  %s3126_s12 = inlined_call_operand.vmem [shape: f32[1,128], index: 12, kind: input, shape index: {}]   ;;  %s3127_s13 = inlined_call_operand.hbm [shape: f32[2,16,128], index: 13, kind: output, shape index: {}]  }
   0x1   :  { %19 = vsyncpa [#allocation6], 0 }
   0x2   :  { %20 = vsyncpa [#allocation4], 0  ;;  %s46_s27 = sshll.u32 %s3119_s5, 4  ;;  %s2454_s28 = smov [#allocation5]   ;;  %s47_s27 = int_to_ptr.hbm [resolvable:$true] %s46_s27 }
   0x3   :  { %s48_s29 = sshll.u32 %s2454_s28, 4  ;;  %s33_s15 = sshll.u32 %s3118_s4, 4  ;;  %s49_s29 = int_to_ptr.vmem [resolvable:$true] %s48_s29  ;;  %s34_s15 = int_to_ptr.hbm [resolvable:$true] %s33_s15 }
   0x4   :  { %s2455_s16 = smov 128   ;;  %s2456_s17 = smov 8  }
   0x5   :  { %54 = dma.hbm_to_vmem [thread:$0]  %s47_s27, 3072, %s49_s29, [#allocation6], %s2455_s16, %s2455_s16, %s2456_s17  }
   0x6   :  { %s2457_s18 = smov [#allocation2]   ;;  %s61_s5 = sshll.u32 %s3121_s7, 4  ;;  %s62_s5 = int_to_ptr.hbm [resolvable:$true] %s61_s5 }
   0x7   :  { %s35_s19 = sshll.u32 %s2457_s18, 4  ;;  %s2458_s4 = smov [#allocation7]   ;;  %s36_s19 = int_to_ptr.vmem [resolvable:$true] %s35_s19 }
   0x8   :  { %41 = dma.hbm_to_vmem [thread:$0]  %s34_s15, 3072, %s36_s19, [#allocation3], %s2455_s16, %s2455_s16, %s2456_s17  }
   0x9   :  { %s63_s22 = sshll.u32 %s2458_s4, 4  ;;  %s64_s22 = int_to_ptr.vmem [resolvable:$true] %s63_s22 }
   0xa   :  { %69 = dma.hbm_to_vmem [thread:$0]  %s62_s5, 3072, %s64_s22, [#allocation6], %s2455_s16, %s2455_s16, %s2456_s17  }
   0xb   :  { %2448 = dma.done.wait [#allocation3], 3072  }
   0xc   :  { %2449 = vsyncadd [#allocation3], 4294964224 }
   0xd   :  { %2450 = dma.done.wait [#allocation6], 6144  }
   0xe   :  { %2451 = vsyncadd [#allocation6], 4294961152  ;;  %v96_v0 = vlaneseq  ;;  %vm197_vm0 = vcmask 1043456   ;;  %vm184_vm1 = vcmask 31744   ;;  %v183_v5 = vld [vmem:[%s3116_s2] sm:$0xf] }
   0xf   :  { %v182_v6 = vld [vmem:[%s3115_s1] sm:$0xf]  ;;  %2060 = vmatpush.msk.msra.mxu0 %vm197_vm0, %v183_v5  ;;  %2184 = vmatpush.msk.msra.mxu2 %vm197_vm0, %v183_v5  ;;  %v94_v9 = vld [vmem:[%s3114_s0 + $0x10] sm:$0xff]  ;;  %v95_v10 = vld [vmem:[%s3114_s0 + $0x18] sm:$0xff]  ;;  %vm302_vm5 = vcmask 261120   ;;  %s2459_s19 = smov 96  }
  0x10   :  { %v2549_v1 = vshrl.u32 %v96_v0, 7  ;;  %v92_v7 = vld [vmem:[%s3114_s0] sm:$0xff]  ;;  %v93_v11 = vld [vmem:[%s3114_s0 + $0x8] sm:$0xff]  ;;  %2065 = vmatpush.msk.msra.mxu1 %vm197_vm0, %v182_v6  ;;  %2185 = vmatpush.msk.msra.mxu3 %vm197_vm0, %v182_v6  ;;  %v163_v12 = vrot.slane %v94_v9, 7  ;;  %v164_v13 = vrot.slane %v95_v10, 7  ;;  %v301_v15 = vld [vmem:[#allocation5 + $0x18] sm:$0xff] }
  0x11   :  { %v161_v8 = vrot.slane %v92_v7, 7  ;;  %v162_v14 = vrot.slane %v93_v11, 7  ;;  %2061 = vmatmul.msk.f32.vlgmr.msra.gmra.mxu0 %vm184_vm1, %v92_v7  ;;  %2063 = vmatmul.msk.f32.vlgmr.msra.gmra.mxu2 %vm184_vm1, %v94_v9  ;;  %v300_v22 = vld [vmem:[#allocation5 + $0x10] sm:$0xff]  ;;  %v299_v23 = vld [vmem:[#allocation5 + $0x8] sm:$0xff]  ;;  %v298_v24 = vld [vmem:[#allocation5] sm:$0xff]  ;;  %s2046_s2 = sshll.u32 %s3127_s13, 4  ;;  %s2047_s2 = int_to_ptr.hbm [resolvable:$true] %s2046_s2 }
  0x12   :  { %v2552_v2 = vand.u32 15, %v2549_v1  ;;  %v99_v3 = vadd.s32 16, %v2549_v1  ;;  %vm165_vm2 = vcmp.lt.s32.totalorder %v2549_v1, 1  ;;  %327 = vmatpush.msrb.mxu2 %v301_v15  ;;  %v297_v25 = vld [vmem:[#allocation2 + $0x18] sm:$0xff]  ;;  %v296_v26 = vld [vmem:[#allocation2 + $0x10] sm:$0xff]  ;;  %v295_v27 = vld [vmem:[#allocation2 + $0x8] sm:$0xff] }
  0x13   :  { %v169_v16 = vsel %vm165_vm2, %v164_v13, %v161_v8  ;;  %v167_v17 = vsel %vm165_vm2, %v162_v14, %v163_v12  ;;  %v168_v20 = vsel %vm165_vm2, %v161_v8, %v162_v14  ;;  %v166_v21 = vsel %vm165_vm2, %v163_v12, %v164_v13  ;;  %368 = vmatpush.msrb.mxu3 %v297_v25  ;;  %v294_v28 = vld [vmem:[#allocation2] sm:$0xff] }
  0x14   :  { %v2555_v4 = vand.u32 15, %v99_v3  ;;  %vm149_vm3 = vcmp.lt.s32.totalorder %v2552_v2, 1  ;;  %328 = vmatpush.msrb.mxu2 %v300_v22  ;;  %v2193_v30 = vld [vmem:[%s3117_s3] ss:$0 sm:$0xff]  ;;  %v495_v22 = vld [vmem:[#allocation7 + $0x10] sm:$0xff] }
  0x15   :  { %v178_v18 = vsel %vm149_vm3, 0.0, %v169_v16  ;;  %369 = vmatpush.msrb.mxu3 %v296_v26  ;;  %v2194_v57 = vld [vmem:[%s3120_s6] ss:$0 sm:$0xff] }
  0x16   :  { %vm151_vm4 = vcmp.lt.s32.totalorder %v2555_v4, 1  ;;  %2066 = vmatmul.msk.f32.vlgmr.msra.gmra.mxu1 %vm184_vm1, %v178_v18  ;;  %329 = vmatpush.msrb.mxu2 %v299_v23 }
  0x17   :  { %v180_v19 = vsel %vm151_vm4, 0.0, %v167_v17  ;;  %370 = vmatpush.msrb.mxu3 %v295_v27  ;;  %v494_v27 = vld [vmem:[#allocation7 + $0x8] sm:$0xff] }
  0x18   :  { %2068 = vmatmul.msk.f32.vlgmr.msra.gmra.mxu3 %vm184_vm1, %v180_v19  ;;  %330 = vmatpush.msrb.mxu2 %v298_v24 }
  0x19   :  { %2062 = vmatmul.msk.f32.gmra.mxu0 %vm184_vm1, %v93_v11  ;;  %2064 = vmatmul.msk.f32.gmra.mxu2 %vm184_vm1, %v95_v10 }
  0x1a   :  { %371 = vmatpush.msrb.mxu3 %v294_v28 }
  0x1e   :  { %2067 = vmatmul.msk.f32.gmra.mxu1 %vm184_vm1, %v168_v20 }
  0x20   :  { %2069 = vmatmul.msk.f32.gmra.mxu3 %vm184_vm1, %v166_v21  ;;  %v496_v21 = vld [vmem:[#allocation7 + $0x18] sm:$0xff] }
  0x21   :  { %525 = vmatpush.msrb.mxu0 %v496_v21 }
  0x23   :  { %526 = vmatpush.msrb.mxu0 %v495_v22 }
  0x25   :  { %527 = vmatpush.msrb.mxu0 %v494_v27  ;;  %v578_v27 = vld [vmem:[#allocation5 + $0x28] sm:$0xff] }
  0x8e   :  { %v218_v29 = vpop.f32.mrf.mxu0 }
  0x93   :  { %v262_v31 = vpop.f32.mrf.mxu1 }
  0x94   :  { %v263_v32 = vadd.f32 %v262_v31, %v218_v29  ;;  %v224_v34 = vpop.f32.mrf.mxu2  ;;  %v493_v31 = vld [vmem:[#allocation7] sm:$0xff] }
  0x95   :  { %528 = vmatpush.msrb.mxu0 %v493_v31  ;;  %v572_v31 = vld [vmem:[#allocation2 + $0x20] sm:$0xff] }
  0x96   :  { %v2605_v33 = vadd.f32 %v2193_v30, %v263_v32  ;;  %v221_v36 = vpop.f32.mrf.mxu0 }
  0x98   :  { %2070 = vmatmul.msk.f32.vlgmr.msrb.gmra.mxu2 %vm302_vm5, %v2605_v33  ;;  %v282_v44 = vrot.slane %v2605_v33, 7 }
  0x9b   :  { %v268_v35 = vpop.f32.mrf.mxu3  ;;  %v265_v37 = vpop.f32.mrf.mxu1 }
  0x9c   :  { %v266_v38 = vadd.f32 %v265_v37, %v221_v36  ;;  %v227_v40 = vpop.f32.mrf.mxu2  ;;  %v269_v42 = vadd.f32 %v268_v35, %v224_v34 }
  0x9e   :  { %v2609_v39 = vadd.f32 %v2193_v30, %v266_v38  ;;  %v2616_v46 = vadd.f32 %v2193_v30, %v269_v42 }
  0xa0   :  { %2071 = vmatmul.msk.f32.gmra.mxu2 %vm302_vm5, %v2609_v39  ;;  %v283_v50 = vrot.slane %v2609_v39, 7  ;;  %v284_v52 = vrot.slane %v2616_v46, 7 }
  0xa2   :  { %v288_v51 = vsel %vm165_vm2, %v282_v44, %v283_v50  ;;  %v287_v53 = vsel %vm165_vm2, %v283_v50, %v284_v52 }
  0xa3   :  { %v271_v41 = vpop.f32.mrf.mxu3  ;;  %v292_v54 = vsel %vm151_vm4, 0.0, %v287_v53 }
  0xa4   :  { %v272_v43 = vadd.f32 %v271_v41, %v227_v40 }
  0xa6   :  { %v2614_v45 = vadd.f32 %v2193_v30, %v272_v43 }
  0xa8   :  { %v285_v47 = vrot.slane %v2614_v45, 7  ;;  %2072 = vmatmul.msk.f32.gmra.mxu2 %vm302_vm5, %v2616_v46 }
  0xaa   :  { %v289_v48 = vsel %vm165_vm2, %v285_v47, %v282_v44  ;;  %v286_v55 = vsel %vm165_vm2, %v284_v52, %v285_v47 }
  0xab   :  { %v290_v49 = vsel %vm149_vm3, 0.0, %v289_v48 }
  0xac   :  { %2074 = vmatmul.msk.f32.vlgmr.msrb.gmra.mxu3 %vm302_vm5, %v290_v49 }
  0xb0   :  { %2073 = vmatmul.msk.f32.gmra.mxu2 %vm302_vm5, %v2614_v45 }
  0xb4   :  { %2075 = vmatmul.msk.f32.gmra.mxu3 %vm302_vm5, %v288_v51 }
  0xbc   :  { %2076 = vmatmul.msk.f32.gmra.mxu3 %vm302_vm5, %v292_v54 }
  0xc4   :  { %2077 = vmatmul.msk.f32.gmra.mxu3 %vm302_vm5, %v286_v55 }
 0x11b   :  { %v332_v56 = vpop.f32.mrf.mxu2 }
 0x123   :  { %v335_v61 = vpop.f32.mrf.mxu2 }
 0x12b   :  { %v338_v7 = vpop.f32.mrf.mxu2 }
 0x12f   :  { %v373_v58 = vpop.f32.mrf.mxu3 }
 0x130   :  { %v374_v59 = vadd.f32 %v373_v58, %v332_v56 }
 0x132   :  { %v2644_v60 = vadd.f32 %v2194_v57, %v374_v59 }
 0x133   :  { %v341_v17 = vpop.f32.mrf.mxu2 }
 0x134   :  { %v2078_v62 = vmul.f32 -1.442695, %v2644_v60 }
 0x136   :  { %2208 = vpow2.f32 %v2078_v62 }
 0x137   :  { %v376_v63 = vpop.f32.mrf.mxu3 }
 0x138   :  { %v377_v0 = vadd.f32 %v376_v63, %v335_v61 }
 0x13a   :  { %v2647_v3 = vadd.f32 %v2194_v57, %v377_v0 }
 0x13c   :  { %v2209_v5 = vpop.eup %2208  ;;  %v2079_v6 = vmul.f32 -1.442695, %v2647_v3 }
 0x13d   :  { %v409_v8 = vadd.f32 1.0, %v2209_v5 }
 0x13e   :  { %2210 = vpow2.f32 %v2079_v6 }
 0x13f   :  { %2212 = vrcp.f32 %v409_v8  ;;  %v379_v9 = vpop.f32.mrf.mxu3  ;;  %v424_v23 = vand.u32 2147483648, %v409_v8  ;;  %v422_v26 = vand.u32 2147483647, %v409_v8  ;;  %vm418_vm7 = vweird.f32 %v409_v8 }
 0x140   :  { %v380_v10 = vadd.f32 %v379_v9, %v338_v7 }
 0x141   :  { %v425_v35 = vor.u32 1.1754944e-38, %v424_v23  ;;  %vm423_vm9 = vcmp.eq.f32.partialorder %v422_v26, 8.507059e+37 }
 0x142   :  { %v2650_v11 = vadd.f32 %v2194_v57, %v380_v10 }
 0x144   :  { %v2211_v12 = vpop.eup %2210  ;;  %v2080_v13 = vmul.f32 -1.442695, %v2650_v11 }
 0x145   :  { %v2213_v14 = vpop.eup %2212  ;;  %v410_v15 = vadd.f32 1.0, %v2211_v12 }
 0x146   :  { %2214 = vpow2.f32 %v2080_v13  ;;  %v414_v16 = vmul.f32 %v2213_v14, %v409_v8  ;;  %vm419_vm6 = vweird.f32 %v2213_v14 }
 0x147   :  { %2216 = vrcp.f32 %v410_v15  ;;  %v382_v18 = vpop.f32.mrf.mxu3  ;;  %vm420_vm8 = vmor %vm418_vm7, %vm419_vm6  ;;  %v439_v41 = vand.u32 2147483648, %v410_v15  ;;  %v437_v43 = vand.u32 2147483647, %v410_v15  ;;  %vm433_vm11 = vweird.f32 %v410_v15 }
 0x148   :  { %v383_v19 = vadd.f32 %v382_v18, %v341_v17  ;;  %v415_v20 = vsub.f32 1.0, %v414_v16 }
 0x149   :  { %v440_v50 = vor.u32 1.1754944e-38, %v439_v41  ;;  %vm438_vm13 = vcmp.eq.f32.partialorder %v437_v43, 8.507059e+37 }
 0x14a   :  { %v2653_v24 = vadd.f32 %v2194_v57, %v383_v19  ;;  %v416_v25 = vmul.f32 %v2213_v14, %v415_v20 }
 0x14c   :  { %v2215_v28 = vpop.eup %2214  ;;  %v2081_v29 = vmul.f32 -1.442695, %v2653_v24  ;;  %v417_v30 = vadd.f32 %v2213_v14, %v416_v25 }
 0x14d   :  { %v2217_v32 = vpop.eup %2216  ;;  %v411_v34 = vadd.f32 1.0, %v2215_v28  ;;  %v577_v28 = vld [vmem:[#allocation5 + $0x20] sm:$0xff] }
 0x14e   :  { %2218 = vpow2.f32 %v2081_v29  ;;  %v421_v36 = vsel %vm420_vm8, %v2213_v14, %v417_v30  ;;  %v429_v37 = vmul.f32 %v2217_v32, %v410_v15  ;;  %vm434_vm10 = vweird.f32 %v2217_v32  ;;  %v580_v14 = vld [vmem:[#allocation5 + $0x38] sm:$0xff]  ;;  %v574_v29 = vld [vmem:[#allocation2 + $0x30] sm:$0xff]  ;;  %v573_v30 = vld [vmem:[#allocation2 + $0x28] sm:$0xff] }
 0x14f   :  { %2220 = vrcp.f32 %v411_v34  ;;  %v426_v38 = vsel %vm423_vm9, %v425_v35, %v421_v36  ;;  %vm435_vm12 = vmor %vm433_vm11, %vm434_vm10  ;;  %v454_v55 = vand.u32 2147483648, %v411_v34  ;;  %v452_v57 = vand.u32 2147483647, %v411_v34  ;;  %605 = vmatpush.msrb.mxu1 %v580_v14 }
 0x150   :  { %477 = vrot.lane.b32.xlu0 %v426_v38, %s2459_s19  ;;  %v430_v40 = vsub.f32 1.0, %v429_v37  ;;  %vm448_vm15 = vweird.f32 %v411_v34  ;;  %vm153_vm10 = vcmp.lt.s32.totalorder %v2552_v2, 2  ;;  %vm554_vm11 = vcmp.lt.s32.totalorder %v2549_v1, 2 }
 0x151   :  { %v455_v61 = vor.u32 1.1754944e-38, %v454_v55  ;;  %vm453_vm1 = vcmp.eq.f32.partialorder %v452_v57, 8.507059e+37  ;;  %v2196_v55 = vld [vmem:[%s3120_s6 + $0x1] ss:$0 sm:$0xff] }
 0x152   :  { %v431_v42 = vmul.f32 %v2217_v32, %v430_v40 }
 0x154   :  { %v2219_v44 = vpop.eup %2218  ;;  %v432_v47 = vadd.f32 %v2217_v32, %v431_v42 }
 0x155   :  { %v2221_v48 = vpop.eup %2220  ;;  %v412_v49 = vadd.f32 1.0, %v2219_v44 }
 0x156   :  { %v436_v51 = vsel %vm435_vm12, %v2217_v32, %v432_v47  ;;  %v444_v52 = vmul.f32 %v2221_v48, %v411_v34  ;;  %vm449_vm14 = vweird.f32 %v2221_v48  ;;  %vm155_vm12 = vcmp.lt.s32.totalorder %v2555_v4, 2 }
 0x157   :  { %2222 = vrcp.f32 %v412_v49  ;;  %v441_v53 = vsel %vm438_vm13, %v440_v50, %v436_v51  ;;  %vm450_vm0 = vmor %vm448_vm15, %vm449_vm14  ;;  %v469_v6 = vand.u32 2147483648, %v412_v49  ;;  %v467_v8 = vand.u32 2147483647, %v412_v49 }
 0x158   :  { %479 = vrot.lane.b32.xlu0 %v441_v53, %s2459_s19  ;;  %v445_v54 = vsub.f32 1.0, %v444_v52  ;;  %vm463_vm7 = vweird.f32 %v412_v49  ;;  %2224 = vtanh.f32 %v2644_v60 }
 0x159   :  { %v470_v10 = vor.u32 1.1754944e-38, %v469_v6  ;;  %vm468_vm9 = vcmp.eq.f32.partialorder %v467_v8, 8.507059e+37  ;;  %2226 = vtanh.f32 %v2647_v3  ;;  %v579_v3 = vld [vmem:[#allocation5 + $0x30] sm:$0xff] }
 0x15a   :  { %v446_v56 = vmul.f32 %v2221_v48, %v445_v54  ;;  %2228 = vtanh.f32 %v2650_v11  ;;  %606 = vmatpush.msrb.mxu1 %v579_v3  ;;  %v575_v11 = vld [vmem:[#allocation2 + $0x38] sm:$0xff] }
 0x15b   :  { %2230 = vtanh.f32 %v2653_v24  ;;  %646 = vmatpush.msra.mxu2 %v575_v11  ;;  %v2195_v24 = vld [vmem:[%s3122_s8] ss:$0 sm:$0xff] }
 0x15c   :  { %v447_v58 = vadd.f32 %v2221_v48, %v446_v56  ;;  %607 = vmatpush.msrb.mxu1 %v578_v27  ;;  %v774_v27 = vld [vmem:[#allocation7 + $0x28] sm:$0xff] }
 0x15d   :  { %v2223_v59 = vpop.eup %2222  ;;  %647 = vmatpush.msra.mxu2 %v574_v29 }
 0x15e   :  { %v451_v62 = vsel %vm450_vm0, %v2221_v48, %v447_v58  ;;  %v459_v63 = vmul.f32 %v2223_v59, %v412_v49  ;;  %vm464_vm6 = vweird.f32 %v2223_v59  ;;  %v2225_v15 = vpop.eup %2224  ;;  %608 = vmatpush.msrb.mxu1 %v577_v28 }
 0x15f   :  { %v456_v0 = vsel %vm453_vm1, %v455_v61, %v451_v62  ;;  %vm465_vm8 = vmor %vm463_vm7, %vm464_vm6  ;;  %v2227_v18 = vpop.eup %2226  ;;  %648 = vmatpush.msra.mxu2 %v573_v30 }
 0x160   :  { %481 = vrot.lane.b32.xlu1 %v456_v0, %s2459_s19  ;;  %v460_v5 = vsub.f32 1.0, %v459_v63  ;;  %v2229_v21 = vpop.eup %2228 }
 0x161   :  { %v2231_v60 = vpop.eup %2230  ;;  %649 = vmatpush.msra.mxu2 %v572_v31 }
 0x162   :  { %v461_v7 = vmul.f32 %v2223_v59, %v460_v5 }
 0x164   :  { %v462_v9 = vadd.f32 %v2223_v59, %v461_v7 }
 0x166   :  { %v466_v12 = vsel %vm465_vm8, %v2223_v59, %v462_v9 }
 0x167   :  { %v471_v13 = vsel %vm468_vm9, %v470_v10, %v466_v12 }
 0x168   :  { %483 = vrot.lane.b32.xlu1 %v471_v13, %s2459_s19 }
 0x1c2   :  { %v478_v16 = vpop.permute.xlu0 %477 }
 0x1c3   :  { %v489_v17 = vmul.f32 %v2225_v15, %v478_v16 }
 0x1c5   :  { %2082 = vmatmul.msk.f32.vlgmr.msrb.gmra.mxu0 %vm302_vm5, %v489_v17 }
 0x1ca   :  { %v480_v19 = vpop.permute.xlu0 %479 }
 0x1cb   :  { %v490_v20 = vmul.f32 %v2227_v18, %v480_v19 }
 0x1cd   :  { %2083 = vmatmul.msk.f32.gmra.mxu0 %vm302_vm5, %v490_v20 }
 0x1d2   :  { %v482_v22 = vpop.permute.xlu1 %481 }
 0x1d3   :  { %v491_v23 = vmul.f32 %v2229_v21, %v482_v22  ;;  %v776_v22 = vld [vmem:[#allocation7 + $0x38] sm:$0xff] }
 0x1d4   :  { %806 = vmatpush.msra.mxu3 %v776_v22 }
 0x1d5   :  { %2084 = vmatmul.msk.f32.gmra.mxu0 %vm302_vm5, %v491_v23  ;;  %v775_v23 = vld [vmem:[#allocation7 + $0x30] sm:$0xff] }
 0x1d6   :  { %807 = vmatpush.msra.mxu3 %v775_v23 }
 0x1d8   :  { %808 = vmatpush.msra.mxu3 %v774_v27 }
 0x1da   :  { %v484_v25 = vpop.permute.xlu1 %483 }
 0x1db   :  { %v492_v26 = vmul.f32 %v2231_v60, %v484_v25 }
 0x1dd   :  { %2085 = vmatmul.msk.f32.gmra.mxu0 %vm302_vm5, %v492_v26 }
 0x242   :  { %v530_v32 = vpop.f32.mrf.mxu0 }
 0x243   :  { %v2671_v34 = vadd.f32 %v2195_v24, %v530_v32 }
 0x245   :  { %v2675_v35 = vadd.f32 %v2671_v34, %v2605_v33 }
 0x247   :  { %2086 = vmatmul.msk.f32.vlgmr.msrb.gmra.mxu1 %vm302_vm5, %v2675_v35  ;;  %v550_v44 = vrot.slane %v2675_v35, 6 }
 0x24a   :  { %v533_v36 = vpop.f32.mrf.mxu0 }
 0x24b   :  { %v2679_v37 = vadd.f32 %v2195_v24, %v533_v36 }
 0x24d   :  { %v2683_v38 = vadd.f32 %v2679_v37, %v2609_v39 }
 0x24f   :  { %2087 = vmatmul.msk.f32.gmra.mxu1 %vm302_vm5, %v2683_v38 }
 0x252   :  { %v536_v40 = vpop.f32.mrf.mxu0 }
 0x253   :  { %v2687_v41 = vadd.f32 %v2195_v24, %v536_v40 }
 0x255   :  { %v2691_v33 = vadd.f32 %v2687_v41, %v2616_v46 }
 0x257   :  { %2088 = vmatmul.msk.f32.gmra.mxu1 %vm302_vm5, %v2691_v33  ;;  %v552_v50 = vrot.slane %v2691_v33, 6 }
 0x25a   :  { %v539_v42 = vpop.f32.mrf.mxu0 }
 0x25b   :  { %v2695_v43 = vadd.f32 %v2195_v24, %v539_v42 }
 0x25d   :  { %v2699_v39 = vadd.f32 %v2695_v43, %v2614_v45  ;;  %v551_v45 = vrot.slane %v2683_v38, 6 }
 0x25f   :  { %v553_v47 = vrot.slane %v2699_v39, 6  ;;  %2089 = vmatmul.msk.f32.gmra.mxu1 %vm302_vm5, %v2699_v39  ;;  %v557_v49 = vsel %vm554_vm11, %v550_v44, %v551_v45  ;;  %v556_v51 = vsel %vm554_vm11, %v551_v45, %v552_v50 }
 0x260   :  { %v569_v52 = vsel %vm155_vm12, 0.0, %v556_v51 }
 0x261   :  { %v558_v46 = vsel %vm554_vm11, %v553_v47, %v550_v44  ;;  %v555_v53 = vsel %vm554_vm11, %v552_v50, %v553_v47 }
 0x262   :  { %v567_v48 = vsel %vm153_vm10, 0.0, %v558_v46 }
 0x263   :  { %2090 = vmatmul.msk.f32.vlgmr.msra.gmra.mxu2 %vm302_vm5, %v567_v48 }
 0x26b   :  { %2091 = vmatmul.msk.f32.gmra.mxu2 %vm302_vm5, %v557_v49 }
 0x273   :  { %2092 = vmatmul.msk.f32.gmra.mxu2 %vm302_vm5, %v569_v52 }
 0x27b   :  { %2093 = vmatmul.msk.f32.gmra.mxu2 %vm302_vm5, %v555_v53 }
 0x2c4   :  { %v610_v54 = vpop.f32.mrf.mxu1 }
 0x2cc   :  { %v613_v59 = vpop.f32.mrf.mxu1 }
 0x2d4   :  { %v616_v7 = vpop.f32.mrf.mxu1 }
 0x2dc   :  { %v619_v18 = vpop.f32.mrf.mxu1 }
 0x2e6   :  { %v651_v56 = vpop.f32.mrf.mxu2 }
 0x2e7   :  { %v652_v57 = vadd.f32 %v651_v56, %v610_v54 }
 0x2e9   :  { %v2729_v58 = vadd.f32 %v2196_v55, %v652_v57 }
 0x2eb   :  { %v2095_v61 = vmul.f32 -1.442695, %v2729_v58 }
 0x2ed   :  { %2232 = vpow2.f32 %v2095_v61 }
 0x2ee   :  { %v654_v62 = vpop.f32.mrf.mxu2 }
 0x2ef   :  { %v655_v63 = vadd.f32 %v654_v62, %v613_v59 }
 0x2f1   :  { %v2732_v0 = vadd.f32 %v2196_v55, %v655_v63 }
 0x2f3   :  { %v2233_v5 = vpop.eup %2232  ;;  %v2096_v6 = vmul.f32 -1.442695, %v2732_v0 }
 0x2f4   :  { %v688_v8 = vadd.f32 1.0, %v2233_v5 }
 0x2f5   :  { %2234 = vpow2.f32 %v2096_v6 }
 0x2f6   :  { %2236 = vrcp.f32 %v688_v8  ;;  %v657_v9 = vpop.f32.mrf.mxu2  ;;  %v703_v60 = vand.u32 2147483648, %v688_v8  ;;  %v701_v3 = vand.u32 2147483647, %v688_v8  ;;  %vm697_vm14 = vweird.f32 %v688_v8 }
 0x2f7   :  { %v658_v10 = vadd.f32 %v657_v9, %v616_v7 }
 0x2f8   :  { %v704_v31 = vor.u32 1.1754944e-38, %v703_v60  ;;  %vm702_vm0 = vcmp.eq.f32.partialorder %v701_v3, 8.507059e+37 }
 0x2f9   :  { %v2735_v12 = vadd.f32 %v2196_v55, %v658_v10 }
 0x2fb   :  { %v2235_v13 = vpop.eup %2234  ;;  %v2097_v14 = vmul.f32 -1.442695, %v2735_v12 }
 0x2fc   :  { %v2237_v15 = vpop.eup %2236  ;;  %v689_v16 = vadd.f32 1.0, %v2235_v13 }
 0x2fd   :  { %2238 = vpow2.f32 %v2097_v14  ;;  %v693_v17 = vmul.f32 %v2237_v15, %v688_v8  ;;  %vm698_vm13 = vweird.f32 %v2237_v15 }
 0x2fe   :  { %2240 = vrcp.f32 %v689_v16  ;;  %v660_v19 = vpop.f32.mrf.mxu2  ;;  %vm699_vm15 = vmor %vm697_vm14, %vm698_vm13  ;;  %v718_v44 = vand.u32 2147483648, %v689_v16  ;;  %v716_v46 = vand.u32 2147483647, %v689_v16  ;;  %vm712_vm6 = vweird.f32 %v689_v16 }
 0x2ff   :  { %v661_v20 = vadd.f32 %v660_v19, %v619_v18  ;;  %v694_v21 = vsub.f32 1.0, %v693_v17  ;;  %v773_v18 = vld [vmem:[#allocation7 + $0x20] sm:$0xff] }
 0x300   :  { %v719_v51 = vor.u32 1.1754944e-38, %v718_v44  ;;  %vm717_vm8 = vcmp.eq.f32.partialorder %v716_v46, 8.507059e+37  ;;  %809 = vmatpush.msra.mxu3 %v773_v18  ;;  %v854_v46 = vld [vmem:[#allocation2 + $0x48] sm:$0xff] }
 0x301   :  { %v2738_v25 = vadd.f32 %v2196_v55, %v661_v20  ;;  %v695_v26 = vmul.f32 %v2237_v15, %v694_v21 }
 0x303   :  { %v2239_v28 = vpop.eup %2238  ;;  %v2098_v11 = vmul.f32 -1.442695, %v2738_v25  ;;  %v696_v29 = vadd.f32 %v2237_v15, %v695_v26  ;;  %v861_v26 = vld [vmem:[#allocation5 + $0x58] sm:$0xff] }
 0x304   :  { %v2241_v30 = vpop.eup %2240  ;;  %v690_v24 = vadd.f32 1.0, %v2239_v28  ;;  %886 = vmatpush.msra.mxu0 %v861_v26 }
 0x305   :  { %2242 = vpow2.f32 %v2098_v11  ;;  %v700_v32 = vsel %vm699_vm15, %v2237_v15, %v696_v29  ;;  %v708_v36 = vmul.f32 %v2241_v30, %v689_v16  ;;  %vm713_vm1 = vweird.f32 %v2241_v30  ;;  %v860_v29 = vld [vmem:[#allocation5 + $0x50] sm:$0xff] }
 0x306   :  { %2244 = vrcp.f32 %v690_v24  ;;  %v705_v40 = vsel %vm702_vm0, %v704_v31, %v700_v32  ;;  %vm714_vm7 = vmor %vm712_vm6, %vm713_vm1  ;;  %v733_v56 = vand.u32 2147483648, %v690_v24  ;;  %v731_v59 = vand.u32 2147483647, %v690_v24  ;;  %887 = vmatpush.msra.mxu0 %v860_v29  ;;  %v856_v31 = vld [vmem:[#allocation2 + $0x58] sm:$0xff]  ;;  %v1056_v29 = vld [vmem:[#allocation7 + $0x50] sm:$0xff] }
 0x307   :  { %756 = vrot.lane.b32.xlu2 %v705_v40, %s2459_s19  ;;  %v709_v42 = vsub.f32 1.0, %v708_v36  ;;  %vm727_vm13 = vweird.f32 %v690_v24  ;;  %927 = vmatpush.msra.mxu1 %v856_v31 }
 0x308   :  { %v734_v63 = vor.u32 1.1754944e-38, %v733_v56  ;;  %vm732_vm15 = vcmp.eq.f32.partialorder %v731_v59, 8.507059e+37 }
 0x309   :  { %v710_v47 = vmul.f32 %v2241_v30, %v709_v42 }
 0x30b   :  { %v2243_v48 = vpop.eup %2242  ;;  %v711_v45 = vadd.f32 %v2241_v30, %v710_v47 }
 0x30c   :  { %v2245_v49 = vpop.eup %2244  ;;  %v691_v50 = vadd.f32 1.0, %v2243_v48  ;;  %v853_v48 = vld [vmem:[#allocation2 + $0x40] sm:$0xff] }
 0x30d   :  { %v715_v52 = vsel %vm714_vm7, %v2241_v30, %v711_v45  ;;  %v723_v53 = vmul.f32 %v2245_v49, %v690_v24  ;;  %vm728_vm9 = vweird.f32 %v2245_v49  ;;  %v859_v30 = vld [vmem:[#allocation5 + $0x48] sm:$0xff]  ;;  %v858_v24 = vld [vmem:[#allocation5 + $0x40] sm:$0xff] }
 0x30e   :  { %2246 = vrcp.f32 %v691_v50  ;;  %v720_v54 = vsel %vm717_vm8, %v719_v51, %v715_v52  ;;  %vm729_vm14 = vmor %vm727_vm13, %vm728_vm9  ;;  %v748_v9 = vand.u32 2147483648, %v691_v50  ;;  %v746_v13 = vand.u32 2147483647, %v691_v50  ;;  %888 = vmatpush.msra.mxu0 %v859_v30 }
 0x30f   :  { %758 = vrot.lane.b32.xlu2 %v720_v54, %s2459_s19  ;;  %v724_v55 = vsub.f32 1.0, %v723_v53  ;;  %vm742_vm1 = vweird.f32 %v691_v50  ;;  %2248 = vtanh.f32 %v2729_v58  ;;  %vm3129_vm8 = vcmp.lt.s32.totalorder %v2552_v2, 4 }
 0x310   :  { %v749_v15 = vor.u32 1.1754944e-38, %v748_v9  ;;  %vm747_vm7 = vcmp.eq.f32.partialorder %v746_v13, 8.507059e+37  ;;  %2250 = vtanh.f32 %v2732_v0  ;;  %889 = vmatpush.msra.mxu0 %v858_v24  ;;  %vm835_vm9 = vcmp.lt.s32.totalorder %v2549_v1, 4 }
 0x311   :  { %v725_v57 = vmul.f32 %v2245_v49, %v724_v55  ;;  %2252 = vtanh.f32 %v2735_v12  ;;  %v855_v12 = vld [vmem:[#allocation2 + $0x50] sm:$0xff]  ;;  %vm3128_vm13 = vcmp.lt.s32.totalorder %v2555_v4, 4 }
 0x312   :  { %2254 = vtanh.f32 %v2738_v25  ;;  %928 = vmatpush.msra.mxu1 %v855_v12  ;;  %v2197_v25 = vld [vmem:[%s3122_s8 + $0x1] ss:$0 sm:$0xff] }
 0x313   :  { %v726_v61 = vadd.f32 %v2245_v49, %v725_v57 }
 0x314   :  { %v2247_v62 = vpop.eup %2246  ;;  %929 = vmatpush.msra.mxu1 %v854_v46 }
 0x315   :  { %v730_v5 = vsel %vm729_vm14, %v2245_v49, %v726_v61  ;;  %v738_v6 = vmul.f32 %v2247_v62, %v691_v50  ;;  %vm743_vm0 = vweird.f32 %v2247_v62  ;;  %v2249_v19 = vpop.eup %2248 }
 0x316   :  { %v735_v7 = vsel %vm732_vm15, %v734_v63, %v730_v5  ;;  %vm744_vm6 = vmor %vm742_vm1, %vm743_vm0  ;;  %v2251_v22 = vpop.eup %2250  ;;  %930 = vmatpush.msra.mxu1 %v853_v48  ;;  %v2198_v63 = vld [vmem:[%s3120_s6 + $0x2] ss:$0 sm:$0xff] }
 0x317   :  { %760 = vrot.lane.b32.xlu0 %v735_v7, %s2459_s19  ;;  %v739_v8 = vsub.f32 1.0, %v738_v6  ;;  %v2253_v3 = vpop.eup %2252 }
 0x318   :  { %v2255_v58 = vpop.eup %2254 }
 0x319   :  { %v740_v10 = vmul.f32 %v2247_v62, %v739_v8 }
 0x31b   :  { %v741_v14 = vadd.f32 %v2247_v62, %v740_v10 }
 0x31d   :  { %v745_v16 = vsel %vm744_vm6, %v2247_v62, %v741_v14 }
 0x31e   :  { %v750_v17 = vsel %vm747_vm7, %v749_v15, %v745_v16 }
 0x31f   :  { %762 = vrot.lane.b32.xlu1 %v750_v17, %s2459_s19 }
 0x361   :  { %v757_v20 = vpop.permute.xlu2 %756 }
 0x362   :  { %v768_v21 = vmul.f32 %v2249_v19, %v757_v20 }
 0x364   :  { %2100 = vmatmul.msk.f32.vlgmr.msra.gmra.mxu3 %vm302_vm5, %v768_v21 }
 0x369   :  { %v759_v23 = vpop.permute.xlu2 %758 }
 0x36a   :  { %v769_v60 = vmul.f32 %v2251_v22, %v759_v23 }
 0x36c   :  { %2101 = vmatmul.msk.f32.gmra.mxu3 %vm302_vm5, %v769_v60 }
 0x389   :  { %v761_v27 = vpop.permute.xlu0 %760 }
 0x38a   :  { %v770_v28 = vmul.f32 %v2253_v3, %v761_v27 }
 0x38c   :  { %2102 = vmatmul.msk.f32.gmra.mxu3 %vm302_vm5, %v770_v28 }
 0x391   :  { %v763_v0 = vpop.permute.xlu1 %762 }
 0x392   :  { %v771_v11 = vmul.f32 %v2255_v58, %v763_v0 }
 0x394   :  { %2103 = vmatmul.msk.f32.gmra.mxu3 %vm302_vm5, %v771_v11  ;;  %v1057_v11 = vld [vmem:[#allocation7 + $0x58] sm:$0xff] }
 0x395   :  { %1087 = vmatpush.msrb.mxu2 %v1057_v11  ;;  %v1054_v11 = vld [vmem:[#allocation7 + $0x40] sm:$0xff] }
 0x397   :  { %1088 = vmatpush.msrb.mxu2 %v1056_v29 }
 0x3e7   :  { %v811_v32 = vpop.f32.mrf.mxu3 }
 0x3e8   :  { %v2756_v36 = vadd.f32 %v2197_v25, %v811_v32 }
 0x3ea   :  { %v2760_v40 = vadd.f32 %v2756_v36, %v2675_v35 }
 0x3ec   :  { %2104 = vmatmul.msk.f32.vlgmr.msra.gmra.mxu0 %vm302_vm5, %v2760_v40  ;;  %v831_v52 = vrot.slane %v2760_v40, 4 }
 0x3ef   :  { %v814_v42 = vpop.f32.mrf.mxu3 }
 0x3f0   :  { %v2764_v44 = vadd.f32 %v2197_v25, %v814_v42 }
 0x3f2   :  { %v2768_v47 = vadd.f32 %v2764_v44, %v2683_v38 }
 0x3f4   :  { %2105 = vmatmul.msk.f32.gmra.mxu0 %vm302_vm5, %v2768_v47 }
 0x40f   :  { %v817_v45 = vpop.f32.mrf.mxu3 }
 0x410   :  { %v2772_v35 = vadd.f32 %v2197_v25, %v817_v45 }
 0x412   :  { %v2776_v49 = vadd.f32 %v2772_v35, %v2691_v33 }
 0x414   :  { %2106 = vmatmul.msk.f32.gmra.mxu0 %vm302_vm5, %v2776_v49  ;;  %v833_v56 = vrot.slane %v2776_v49, 4 }
 0x417   :  { %v820_v50 = vpop.f32.mrf.mxu3 }
 0x418   :  { %v2780_v38 = vadd.f32 %v2197_v25, %v820_v50  ;;  %v1055_v25 = vld [vmem:[#allocation7 + $0x48] sm:$0xff] }
 0x419   :  { %1089 = vmatpush.msrb.mxu2 %v1055_v25 }
 0x41a   :  { %v2784_v51 = vadd.f32 %v2780_v38, %v2699_v39  ;;  %v832_v39 = vrot.slane %v2768_v47, 4 }
 0x41b   :  { %1090 = vmatpush.msrb.mxu2 %v1054_v11 }
 0x41c   :  { %v834_v53 = vrot.slane %v2784_v51, 4  ;;  %2107 = vmatmul.msk.f32.gmra.mxu0 %vm302_vm5, %v2784_v51  ;;  %v838_v55 = vsel %vm835_vm9, %v831_v52, %v832_v39  ;;  %v837_v57 = vsel %vm835_vm9, %v832_v39, %v833_v56 }
 0x41d   :  { %v850_v59 = vsel %vm3128_vm13, 0.0, %v837_v57 }
 0x41e   :  { %v839_v33 = vsel %vm835_vm9, %v834_v53, %v831_v52  ;;  %v836_v61 = vsel %vm835_vm9, %v833_v56, %v834_v53 }
 0x41f   :  { %v848_v54 = vsel %vm3129_vm8, 0.0, %v839_v33 }
 0x420   :  { %2108 = vmatmul.msk.f32.vlgmr.msra.gmra.mxu1 %vm302_vm5, %v848_v54 }
 0x428   :  { %2109 = vmatmul.msk.f32.gmra.mxu1 %vm302_vm5, %v838_v55 }
 0x430   :  { %2110 = vmatmul.msk.f32.gmra.mxu1 %vm302_vm5, %v850_v59 }
 0x438   :  { %2111 = vmatmul.msk.f32.gmra.mxu1 %vm302_vm5, %v836_v61 }
 0x469   :  { %v891_v62 = vpop.f32.mrf.mxu0 }
 0x471   :  { %v894_v9 = vpop.f32.mrf.mxu0 }
 0x491   :  { %v897_v17 = vpop.f32.mrf.mxu0 }
 0x499   :  { %v900_v27 = vpop.f32.mrf.mxu0 }
 0x49d   :  { %v932_v5 = vpop.f32.mrf.mxu1 }
 0x49e   :  { %v933_v6 = vadd.f32 %v932_v5, %v891_v62 }
 0x4a0   :  { %v2814_v7 = vadd.f32 %v2198_v63, %v933_v6 }
 0x4a2   :  { %v2113_v8 = vmul.f32 -1.442695, %v2814_v7 }
 0x4a4   :  { %2256 = vpow2.f32 %v2113_v8 }
 0x4a5   :  { %v935_v10 = vpop.f32.mrf.mxu1 }
 0x4a6   :  { %v936_v13 = vadd.f32 %v935_v10, %v894_v9 }
 0x4a8   :  { %v2817_v14 = vadd.f32 %v2198_v63, %v936_v13 }
 0x4aa   :  { %v2257_v15 = vpop.eup %2256  ;;  %v2114_v16 = vmul.f32 -1.442695, %v2817_v14 }
 0x4ab   :  { %v969_v18 = vadd.f32 1.0, %v2257_v15 }
 0x4ac   :  { %2258 = vpow2.f32 %v2114_v16 }
 0x4ad   :  { %2260 = vrcp.f32 %v969_v18  ;;  %v938_v19 = vpop.f32.mrf.mxu1  ;;  %v984_v30 = vand.u32 2147483648, %v969_v18  ;;  %v982_v12 = vand.u32 2147483647, %v969_v18  ;;  %vm978_vm15 = vweird.f32 %v969_v18 }
 0x4ae   :  { %v939_v20 = vadd.f32 %v938_v19, %v897_v17 }
 0x4af   :  { %v985_v50 = vor.u32 1.1754944e-38, %v984_v30  ;;  %vm983_vm1 = vcmp.eq.f32.partialorder %v982_v12, 8.507059e+37  ;;  %v1133_v12 = vld [vmem:[#allocation5 + $0x78] sm:$0xff] }
 0x4b0   :  { %v2820_v21 = vadd.f32 %v2198_v63, %v939_v20  ;;  %1158 = vmatpush.msrb.mxu3 %v1133_v12 }
 0x4b2   :  { %v2259_v22 = vpop.eup %2258  ;;  %v2115_v23 = vmul.f32 -1.442695, %v2820_v21 }
 0x4b3   :  { %v2261_v60 = vpop.eup %2260  ;;  %v970_v26 = vadd.f32 1.0, %v2259_v22 }
 0x4b4   :  { %2262 = vpow2.f32 %v2115_v23  ;;  %v974_v3 = vmul.f32 %v2261_v60, %v969_v18  ;;  %vm979_vm14 = vweird.f32 %v2261_v60 }
 0x4b5   :  { %2264 = vrcp.f32 %v970_v26  ;;  %v941_v28 = vpop.f32.mrf.mxu1  ;;  %vm980_vm0 = vmor %vm978_vm15, %vm979_vm14  ;;  %v999_v39 = vand.u32 2147483648, %v970_v26  ;;  %v997_v56 = vand.u32 2147483647, %v970_v26  ;;  %vm993_vm7 = vweird.f32 %v970_v26 }
 0x4b6   :  { %v942_v58 = vadd.f32 %v941_v28, %v900_v27  ;;  %v975_v0 = vsub.f32 1.0, %v974_v3 }
 0x4b7   :  { %vm998_vm15 = vcmp.eq.f32.partialorder %v997_v56, 8.507059e+37 }
 0x4b8   :  { %v2823_v24 = vadd.f32 %v2198_v63, %v942_v58  ;;  %v976_v31 = vmul.f32 %v2261_v60, %v975_v0  ;;  %v1000_v63 = vor.u32 1.1754944e-38, %v999_v39  ;;  %v827_v39 = vadd.f32 %v2756_v36, %v2671_v34 }
 0x4ba   :  { %v2263_v32 = vpop.eup %2262  ;;  %v2116_v42 = vmul.f32 -1.442695, %v2823_v24  ;;  %v977_v46 = vadd.f32 %v2261_v60, %v976_v31 }
 0x4bb   :  { %v2265_v48 = vpop.eup %2264  ;;  %v971_v45 = vadd.f32 1.0, %v2263_v32 }
 0x4bc   :  { %2266 = vpow2.f32 %v2116_v42  ;;  %v981_v52 = vsel %vm980_vm0, %v2261_v60, %v977_v46  ;;  %v989_v53 = vmul.f32 %v2265_v48, %v970_v26  ;;  %vm994_vm6 = vweird.f32 %v2265_v48 }
 0x4bd   :  { %2268 = vrcp.f32 %v971_v45  ;;  %v986_v33 = vsel %vm983_vm1, %v985_v50, %v981_v52  ;;  %vm995_vm14 = vmor %vm993_vm7, %vm994_vm6  ;;  %v1014_v10 = vand.u32 2147483648, %v971_v45  ;;  %v1012_v15 = vand.u32 2147483647, %v971_v45 }
 0x4be   :  { %1037 = vrot.lane.b32.xlu2 %v986_v33, %s2459_s19  ;;  %v990_v54 = vsub.f32 1.0, %v989_v53  ;;  %vm1008_vm1 = vweird.f32 %v971_v45  ;;  %v1131_v53 = vld [vmem:[#allocation5 + $0x68] sm:$0xff]  ;;  %v1130_v33 = vld [vmem:[#allocation5 + $0x60] sm:$0xff] }
 0x4bf   :  { %v1015_v18 = vor.u32 1.1754944e-38, %v1014_v10  ;;  %vm1013_vm6 = vcmp.eq.f32.partialorder %v1012_v15, 8.507059e+37 }
 0x4c0   :  { %v991_v55 = vmul.f32 %v2265_v48, %v990_v54  ;;  %v2199_v54 = vld [vmem:[%s3122_s8 + $0x2] ss:$0 sm:$0xff] }
 0x4c2   :  { %v2267_v57 = vpop.eup %2266  ;;  %v992_v59 = vadd.f32 %v2265_v48, %v991_v55 }
 0x4c3   :  { %v2269_v61 = vpop.eup %2268  ;;  %v972_v62 = vadd.f32 1.0, %v2267_v57 }
 0x4c4   :  { %v996_v5 = vsel %vm995_vm14, %v2265_v48, %v992_v59  ;;  %v1004_v6 = vmul.f32 %v2269_v61, %v971_v45  ;;  %vm1009_vm0 = vweird.f32 %v2269_v61  ;;  %v1127_v59 = vld [vmem:[#allocation2 + $0x70] sm:$0xff] }
 0x4c5   :  { %2270 = vrcp.f32 %v972_v62  ;;  %v1001_v8 = vsel %vm998_vm15, %v1000_v63, %v996_v5  ;;  %vm1010_vm13 = vmor %vm1008_vm1, %vm1009_vm0  ;;  %v1029_v60 = vand.u32 2147483648, %v972_v62  ;;  %v1027_v3 = vand.u32 2147483647, %v972_v62 }
 0x4c6   :  { %1039 = vrot.lane.b32.xlu0 %v1001_v8, %s2459_s19  ;;  %v1005_v9 = vsub.f32 1.0, %v1004_v6  ;;  %vm1023_vm14 = vweird.f32 %v972_v62  ;;  %2272 = vtanh.f32 %v2814_v7  ;;  %v828_v5 = vadd.f32 %v2764_v44, %v2679_v37 }
 0x4c7   :  { %v1030_v28 = vor.u32 1.1754944e-38, %v1029_v60  ;;  %vm1028_vm8 = vcmp.eq.f32.partialorder %v1027_v3, 8.507059e+37  ;;  %2274 = vtanh.f32 %v2817_v14  ;;  %v1132_v14 = vld [vmem:[#allocation5 + $0x70] sm:$0xff]  ;;  %v829_v8 = vadd.f32 %v2772_v35, %v2687_v41 }
 0x4c8   :  { %v1006_v13 = vmul.f32 %v2269_v61, %v1005_v9  ;;  %2276 = vtanh.f32 %v2820_v21  ;;  %1159 = vmatpush.msrb.mxu3 %v1132_v14  ;;  %v1128_v21 = vld [vmem:[#allocation2 + $0x78] sm:$0xff]  ;;  %v830_v44 = vadd.f32 %v2780_v38, %v2695_v43 }
 0x4c9   :  { %2278 = vtanh.f32 %v2823_v24  ;;  %1199 = vmatpush.msrb.mxu0 %v1128_v21  ;;  %v1329_v21 = vld [vmem:[#allocation7 + $0x78] sm:$0xff] }
 0x4ca   :  { %v1007_v16 = vadd.f32 %v2269_v61, %v1006_v13  ;;  %1160 = vmatpush.msrb.mxu3 %v1131_v53  ;;  %1359 = vmatpush.msrb.mxu1 %v1329_v21 }
 0x4cb   :  { %v2271_v17 = vpop.eup %2270  ;;  %1200 = vmatpush.msrb.mxu0 %v1127_v59 }
 0x4cc   :  { %v1011_v19 = vsel %vm1010_vm13, %v2269_v61, %v1007_v16  ;;  %v1019_v20 = vmul.f32 %v2271_v17, %v972_v62  ;;  %vm1024_vm7 = vweird.f32 %v2271_v17  ;;  %v2273_v29 = vpop.eup %2272  ;;  %1161 = vmatpush.msrb.mxu3 %v1130_v33  ;;  %v1126_v61 = vld [vmem:[#allocation2 + $0x68] sm:$0xff]  ;;  %v1125_v62 = vld [vmem:[#allocation2 + $0x60] sm:$0xff] }
 0x4cd   :  { %v1016_v22 = vsel %vm1013_vm6, %v1015_v18, %v1011_v19  ;;  %vm1025_vm15 = vmor %vm1023_vm14, %vm1024_vm7  ;;  %v2275_v25 = vpop.eup %2274  ;;  %1201 = vmatpush.msrb.mxu0 %v1126_v61  ;;  %v1327_v61 = vld [vmem:[#allocation7 + $0x68] sm:$0xff] }
 0x4ce   :  { %1041 = vrot.lane.b32.xlu1 %v1016_v22, %s2459_s19  ;;  %v1020_v23 = vsub.f32 1.0, %v1019_v20  ;;  %v2277_v46 = vpop.eup %2276 }
 0x4cf   :  { %v2279_v50 = vpop.eup %2278  ;;  %1202 = vmatpush.msrb.mxu0 %v1125_v62 }
 0x4d0   :  { %v1021_v26 = vmul.f32 %v2271_v17, %v1020_v23  ;;  %v2200_v23 = vld [vmem:[%s3120_s6 + $0x3] ss:$0 sm:$0xff] }
 0x4d2   :  { %v1022_v27 = vadd.f32 %v2271_v17, %v1021_v26 }
 0x4d4   :  { %v1026_v58 = vsel %vm1025_vm15, %v2271_v17, %v1022_v27 }
 0x4d5   :  { %v1031_v0 = vsel %vm1028_vm8, %v1030_v28, %v1026_v58 }
 0x4d6   :  { %1043 = vrot.lane.b32.xlu2 %v1031_v0, %s2459_s19 }
 0x518   :  { %v1038_v30 = vpop.permute.xlu2 %1037 }
 0x519   :  { %v1049_v31 = vmul.f32 %v2273_v29, %v1038_v30 }
 0x51b   :  { %2118 = vmatmul.msk.f32.vlgmr.msrb.gmra.mxu2 %vm302_vm5, %v1049_v31 }
 0x530   :  { %v1044_v7 = vpop.permute.xlu2 %1043 }
 0x531   :  { %v1052_v52 = vmul.f32 %v2279_v50, %v1044_v7 }
 0x538   :  { %v1040_v32 = vpop.permute.xlu0 %1039 }
 0x539   :  { %v1050_v42 = vmul.f32 %v2275_v25, %v1040_v32 }
 0x53b   :  { %2119 = vmatmul.msk.f32.gmra.mxu2 %vm302_vm5, %v1050_v42 }
 0x540   :  { %v1042_v48 = vpop.permute.xlu1 %1041 }
 0x541   :  { %v1051_v45 = vmul.f32 %v2277_v46, %v1042_v48 }
 0x543   :  { %2120 = vmatmul.msk.f32.gmra.mxu2 %vm302_vm5, %v1051_v45 }
 0x54b   :  { %2121 = vmatmul.msk.f32.gmra.mxu2 %vm302_vm5, %v1052_v52 }
 0x59e   :  { %v1092_v24 = vpop.f32.mrf.mxu2 }
 0x59f   :  { %v1093_v55 = vadd.f32 %v2199_v54, %v1092_v24 }
 0x5a1   :  { %v2844_v56 = vadd.f32 %v1093_v55, %v2760_v40  ;;  %v2846_v57 = vadd.f32 %v1093_v55, %v827_v39 }
 0x5a3   :  { %2122 = vmatmul.msk.f32.vlgmr.msrb.gmra.mxu3 %vm302_vm5, %v2844_v56  ;;  %v1112_v41 = vrot.slane %v2844_v56, 7 }
 0x5be   :  { %v1095_v63 = vpop.f32.mrf.mxu2 }
 0x5bf   :  { %v1096_v34 = vadd.f32 %v2199_v54, %v1095_v63 }
 0x5c1   :  { %v2853_v36 = vadd.f32 %v1096_v34, %v2768_v47  ;;  %v2855_v40 = vadd.f32 %v1096_v34, %v828_v5 }
 0x5c3   :  { %2123 = vmatmul.msk.f32.gmra.mxu3 %vm302_vm5, %v2853_v36  ;;  %v1113_v43 = vrot.slane %v2853_v36, 7 }
 0x5c5   :  { %v1118_v38 = vsel %vm165_vm2, %v1112_v41, %v1113_v43 }
 0x5c6   :  { %v1098_v6 = vpop.f32.mrf.mxu2 }
 0x5c7   :  { %v1099_v9 = vadd.f32 %v2199_v54, %v1098_v6 }
 0x5c9   :  { %v2862_v10 = vadd.f32 %v1099_v9, %v2776_v49  ;;  %v2864_v13 = vadd.f32 %v1099_v9, %v829_v8 }
 0x5cb   :  { %2124 = vmatmul.msk.f32.gmra.mxu3 %vm302_vm5, %v2862_v10 }
 0x5ce   :  { %v1101_v37 = vpop.f32.mrf.mxu2 }
 0x5cf   :  { %v1102_v47 = vadd.f32 %v2199_v54, %v1101_v37  ;;  %v1328_v54 = vld [vmem:[#allocation7 + $0x70] sm:$0xff] }
 0x5d0   :  { %1360 = vmatpush.msrb.mxu1 %v1328_v54 }
 0x5d1   :  { %v2871_v15 = vadd.f32 %v1102_v47, %v2784_v51  ;;  %v2873_v16 = vadd.f32 %v1102_v47, %v830_v44  ;;  %v1114_v51 = vrot.slane %v2862_v10, 7 }
 0x5d2   :  { %1361 = vmatpush.msrb.mxu1 %v1327_v61 }
 0x5d3   :  { %v1115_v35 = vrot.slane %v2871_v15, 7  ;;  %2125 = vmatmul.msk.f32.gmra.mxu3 %vm302_vm5, %v2871_v15  ;;  %v1117_v18 = vsel %vm165_vm2, %v1113_v43, %v1114_v51 }
 0x5d4   :  { %v1122_v19 = vsel %vm151_vm4, 0.0, %v1117_v18 }
 0x5d5   :  { %v1119_v49 = vsel %vm165_vm2, %v1115_v35, %v1112_v41  ;;  %v1116_v20 = vsel %vm165_vm2, %v1114_v51, %v1115_v35 }
 0x5d6   :  { %v1120_v17 = vsel %vm149_vm3, 0.0, %v1119_v49 }
 0x5d7   :  { %2126 = vmatmul.msk.f32.vlgmr.msrb.gmra.mxu0 %vm302_vm5, %v1120_v17 }
 0x5df   :  { %2127 = vmatmul.msk.f32.gmra.mxu0 %vm302_vm5, %v1118_v38 }
 0x5e7   :  { %2128 = vmatmul.msk.f32.gmra.mxu0 %vm302_vm5, %v1122_v19 }
 0x5ef   :  { %2129 = vmatmul.msk.f32.gmra.mxu0 %vm302_vm5, %v1116_v20 }
 0x626   :  { %v1163_v22 = vpop.f32.mrf.mxu3 }
 0x646   :  { %v1166_v27 = vpop.f32.mrf.mxu3 }
 0x64e   :  { %v1169_v31 = vpop.f32.mrf.mxu3 }
 0x654   :  { %v1204_v60 = vpop.f32.mrf.mxu0 }
 0x655   :  { %v1205_v26 = vadd.f32 %v1204_v60, %v1163_v22 }
 0x656   :  { %v1172_v52 = vpop.f32.mrf.mxu3 }
 0x657   :  { %v2900_v3 = vadd.f32 %v2200_v23, %v1205_v26 }
 0x659   :  { %v2131_v28 = vmul.f32 -1.442695, %v2900_v3 }
 0x65b   :  { %2280 = vpow2.f32 %v2131_v28 }
 0x65c   :  { %v1207_v58 = vpop.f32.mrf.mxu0 }
 0x65d   :  { %v1208_v0 = vadd.f32 %v1207_v58, %v1166_v27 }
 0x65f   :  { %v2903_v11 = vadd.f32 %v2200_v23, %v1208_v0 }
 0x661   :  { %v2281_v29 = vpop.eup %2280  ;;  %v2132_v30 = vmul.f32 -1.442695, %v2903_v11 }
 0x662   :  { %v1241_v12 = vadd.f32 1.0, %v2281_v29 }
 0x663   :  { %2282 = vpow2.f32 %v2132_v30 }
 0x664   :  { %2284 = vrcp.f32 %v1241_v12  ;;  %v1210_v25 = vpop.f32.mrf.mxu0  ;;  %v1256_v24 = vand.u32 2147483648, %v1241_v12  ;;  %v1254_v59 = vand.u32 2147483647, %v1241_v12  ;;  %vm1250_vm3 = vweird.f32 %v1241_v12 }
 0x665   :  { %v1211_v32 = vadd.f32 %v1210_v25, %v1169_v31 }
 0x666   :  { %v1257_v8 = vor.u32 1.1754944e-38, %v1256_v24  ;;  %vm1255_vm8 = vcmp.eq.f32.partialorder %v1254_v59, 8.507059e+37 }
 0x667   :  { %v2906_v42 = vadd.f32 %v2200_v23, %v1211_v32 }
 0x669   :  { %v2283_v46 = vpop.eup %2282  ;;  %v2133_v48 = vmul.f32 -1.442695, %v2906_v42 }
 0x66a   :  { %v2285_v45 = vpop.eup %2284  ;;  %v1242_v7 = vadd.f32 1.0, %v2283_v46 }
 0x66b   :  { %2286 = vpow2.f32 %v2133_v48  ;;  %v1246_v50 = vmul.f32 %v2285_v45, %v1241_v12  ;;  %vm1251_vm2 = vweird.f32 %v2285_v45 }
 0x66c   :  { %2288 = vrcp.f32 %v1242_v7  ;;  %v1213_v14 = vpop.f32.mrf.mxu0  ;;  %vm1252_vm4 = vmor %vm1250_vm3, %vm1251_vm2  ;;  %v1271_v41 = vand.u32 2147483648, %v1242_v7  ;;  %v1269_v49 = vand.u32 2147483647, %v1242_v7  ;;  %vm1265_vm0 = vweird.f32 %v1242_v7 }
 0x66d   :  { %v1214_v53 = vadd.f32 %v1213_v14, %v1172_v52  ;;  %v1247_v33 = vsub.f32 1.0, %v1246_v50  ;;  %v1326_v52 = vld [vmem:[#allocation7 + $0x60] sm:$0xff]  ;;  %v1405_v14 = vld [vmem:[#allocation5 + $0x98] sm:$0xff] }
 0x66e   :  { %v1272_v18 = vor.u32 1.1754944e-38, %v1271_v41  ;;  %vm1270_vm6 = vcmp.eq.f32.partialorder %v1269_v49, 8.507059e+37  ;;  %1362 = vmatpush.msrb.mxu1 %v1326_v52  ;;  %1430 = vmatpush.msra.mxu2 %v1405_v14 }
 0x66f   :  { %v2909_v39 = vadd.f32 %v2200_v23, %v1214_v53  ;;  %v1248_v55 = vmul.f32 %v2285_v45, %v1247_v33 }
 0x671   :  { %v2287_v62 = vpop.eup %2286  ;;  %v2134_v63 = vmul.f32 -1.442695, %v2909_v39  ;;  %v1249_v5 = vadd.f32 %v2285_v45, %v1248_v55 }
 0x672   :  { %v2289_v34 = vpop.eup %2288  ;;  %v1243_v6 = vadd.f32 1.0, %v2287_v62 }
 0x673   :  { %2290 = vpow2.f32 %v2134_v63  ;;  %v1253_v9 = vsel %vm1252_vm4, %v2285_v45, %v1249_v5  ;;  %v1261_v37 = vmul.f32 %v2289_v34, %v1242_v7  ;;  %vm1266_vm13 = vweird.f32 %v2289_v34 }
 0x674   :  { %2292 = vrcp.f32 %v1243_v6  ;;  %v1258_v44 = vsel %vm1255_vm8, %v1257_v8, %v1253_v9  ;;  %vm1267_vm1 = vmor %vm1265_vm0, %vm1266_vm13  ;;  %v1286_v60 = vand.u32 2147483648, %v1243_v6  ;;  %v1284_v27 = vand.u32 2147483647, %v1243_v6  ;;  %v1399_v8 = vld [vmem:[#allocation2 + $0x90] sm:$0xff]  ;;  %v1398_v9 = vld [vmem:[#allocation2 + $0x88] sm:$0xff] }
 0x675   :  { %1309 = vrot.lane.b32.xlu0 %v1258_v44, %s2459_s19  ;;  %v1262_v47 = vsub.f32 1.0, %v1261_v37  ;;  %vm1280_vm14 = vweird.f32 %v1243_v6  ;;  %v1397_v37 = vld [vmem:[#allocation2 + $0x80] sm:$0xff] }
 0x676   :  { %v1287_v0 = vor.u32 1.1754944e-38, %v1286_v60  ;;  %vm1285_vm2 = vcmp.eq.f32.partialorder %v1284_v27, 8.507059e+37 }
 0x677   :  { %v1263_v35 = vmul.f32 %v2289_v34, %v1262_v47 }
 0x679   :  { %v2291_v17 = vpop.eup %2290  ;;  %v1264_v43 = vadd.f32 %v2289_v34, %v1263_v35 }
 0x67a   :  { %v2293_v38 = vpop.eup %2292  ;;  %v1244_v51 = vadd.f32 1.0, %v2291_v17 }
 0x67b   :  { %v1268_v19 = vsel %vm1267_vm1, %v2289_v34, %v1264_v43  ;;  %v1276_v20 = vmul.f32 %v2293_v38, %v1243_v6  ;;  %vm1281_vm7 = vweird.f32 %v2293_v38  ;;  %v1403_v34 = vld [vmem:[#allocation5 + $0x88] sm:$0xff]  ;;  %v1402_v6 = vld [vmem:[#allocation5 + $0x80] sm:$0xff] }
 0x67c   :  { %2294 = vrcp.f32 %v1244_v51  ;;  %v1273_v22 = vsel %vm1270_vm6, %v1272_v18, %v1268_v19  ;;  %vm1282_vm15 = vmor %vm1280_vm14, %vm1281_vm7  ;;  %v1301_v25 = vand.u32 2147483648, %v1244_v51  ;;  %v1299_v46 = vand.u32 2147483647, %v1244_v51 }
 0x67d   :  { %1311 = vrot.lane.b32.xlu1 %v1273_v22, %s2459_s19  ;;  %v1277_v23 = vsub.f32 1.0, %v1276_v20  ;;  %vm1295_vm4 = vweird.f32 %v1244_v51  ;;  %2296 = vtanh.f32 %v2900_v3 }
 0x67e   :  { %v1302_v45 = vor.u32 1.1754944e-38, %v1301_v25  ;;  %vm1300_vm13 = vcmp.eq.f32.partialorder %v1299_v46, 8.507059e+37  ;;  %2298 = vtanh.f32 %v2903_v11  ;;  %v1404_v11 = vld [vmem:[#allocation5 + $0x90] sm:$0xff] }
 0x67f   :  { %v1278_v26 = vmul.f32 %v2293_v38, %v1277_v23  ;;  %2300 = vtanh.f32 %v2906_v42  ;;  %1431 = vmatpush.msra.mxu2 %v1404_v11  ;;  %v1400_v42 = vld [vmem:[#allocation2 + $0x98] sm:$0xff]  ;;  %v1600_v11 = vld [vmem:[#allocation7 + $0x90] sm:$0xff] }
 0x680   :  { %2302 = vtanh.f32 %v2909_v39  ;;  %1471 = vmatpush.msra.mxu3 %v1400_v42  ;;  %v2201_v39 = vld [vmem:[%s3122_s8 + $0x3] ss:$0 sm:$0xff] }
 0x681   :  { %v1279_v28 = vadd.f32 %v2293_v38, %v1278_v26  ;;  %1432 = vmatpush.msra.mxu2 %v1403_v34 }
 0x682   :  { %v2295_v58 = vpop.eup %2294  ;;  %1472 = vmatpush.msra.mxu3 %v1399_v8 }
 0x683   :  { %v1283_v29 = vsel %vm1282_vm15, %v2293_v38, %v1279_v28  ;;  %v1291_v30 = vmul.f32 %v2295_v58, %v1244_v51  ;;  %vm1296_vm3 = vweird.f32 %v2295_v58  ;;  %v2297_v53 = vpop.eup %2296  ;;  %1433 = vmatpush.msra.mxu2 %v1402_v6 }
 0x684   :  { %v1288_v31 = vsel %vm1285_vm2, %v1287_v0, %v1283_v29  ;;  %vm1297_vm8 = vmor %vm1295_vm4, %vm1296_vm3  ;;  %v2299_v54 = vpop.eup %2298  ;;  %1473 = vmatpush.msra.mxu3 %v1398_v9  ;;  %v2202_v0 = vld [vmem:[%s3120_s6 + $0x4] ss:$0 sm:$0xff] }
 0x685   :  { %1313 = vrot.lane.b32.xlu2 %v1288_v31, %s2459_s19  ;;  %v1292_v12 = vsub.f32 1.0, %v1291_v30  ;;  %v2301_v61 = vpop.eup %2300 }
 0x686   :  { %v2303_v3 = vpop.eup %2302  ;;  %1474 = vmatpush.msra.mxu3 %v1397_v37 }
 0x687   :  { %v1293_v32 = vmul.f32 %v2295_v58, %v1292_v12 }
 0x689   :  { %v1294_v48 = vadd.f32 %v2295_v58, %v1293_v32 }
 0x68b   :  { %v1298_v7 = vsel %vm1297_vm8, %v2295_v58, %v1294_v48 }
 0x68c   :  { %v1303_v50 = vsel %vm1300_vm13, %v1302_v45, %v1298_v7 }
 0x68d   :  { %1315 = vrot.lane.b32.xlu0 %v1303_v50, %s2459_s19 }
 0x6df   :  { %v1314_v59 = vpop.permute.xlu2 %1313 }
 0x6e0   :  { %v1323_v62 = vmul.f32 %v2301_v61, %v1314_v59 }
 0x6e7   :  { %v1310_v33 = vpop.permute.xlu0 %1309 }
 0x6e8   :  { %v1321_v21 = vmul.f32 %v2297_v53, %v1310_v33 }
 0x6ea   :  { %2136 = vmatmul.msk.f32.vlgmr.msrb.gmra.mxu1 %vm302_vm5, %v1321_v21 }
 0x6ef   :  { %v1312_v24 = vpop.permute.xlu1 %1311 }
 0x6f0   :  { %v1322_v55 = vmul.f32 %v2299_v54, %v1312_v24 }
 0x6f2   :  { %2137 = vmatmul.msk.f32.gmra.mxu1 %vm302_vm5, %v1322_v55 }
 0x6fa   :  { %2138 = vmatmul.msk.f32.gmra.mxu1 %vm302_vm5, %v1323_v62 }
 0x6ff   :  { %v1316_v63 = vpop.permute.xlu0 %1315 }
 0x700   :  { %v1324_v5 = vmul.f32 %v2303_v3, %v1316_v63 }
 0x702   :  { %2139 = vmatmul.msk.f32.gmra.mxu1 %vm302_vm5, %v1324_v5  ;;  %v1601_v5 = vld [vmem:[#allocation7 + $0x98] sm:$0xff] }
 0x703   :  { %1631 = vmatpush.msra.mxu0 %v1601_v5 }
 0x705   :  { %1632 = vmatpush.msra.mxu0 %v1600_v11 }
 0x767   :  { %v1364_v44 = vpop.f32.mrf.mxu1 }
 0x768   :  { %v1365_v47 = vadd.f32 %v2201_v39, %v1364_v44 }
 0x76a   :  { %v2928_v41 = vadd.f32 %v1365_v47, %v2844_v56  ;;  %v2931_v35 = vadd.f32 %v1365_v47, %v2846_v57 }
 0x76c   :  { %2140 = vmatmul.msk.f32.vlgmr.msra.gmra.mxu2 %vm302_vm5, %v2928_v41  ;;  %v1384_v22 = vrot.slane %v2928_v41, 6 }
 0x76f   :  { %v1367_v49 = vpop.f32.mrf.mxu1 }
 0x770   :  { %v1368_v17 = vadd.f32 %v2201_v39, %v1367_v49 }
 0x772   :  { %v2936_v43 = vadd.f32 %v1368_v17, %v2853_v36  ;;  %v2939_v38 = vadd.f32 %v1368_v17, %v2855_v40 }
 0x774   :  { %2141 = vmatmul.msk.f32.gmra.mxu2 %vm302_vm5, %v2936_v43 }
 0x777   :  { %v1370_v51 = vpop.f32.mrf.mxu1 }
 0x778   :  { %v1371_v56 = vadd.f32 %v2201_v39, %v1370_v51 }
 0x77a   :  { %v2944_v18 = vadd.f32 %v1371_v56, %v2862_v10  ;;  %v2947_v57 = vadd.f32 %v1371_v56, %v2864_v13 }
 0x77c   :  { %2142 = vmatmul.msk.f32.gmra.mxu2 %vm302_vm5, %v2944_v18  ;;  %v1386_v60 = vrot.slane %v2944_v18, 6 }
 0x77f   :  { %v1373_v19 = vpop.f32.mrf.mxu1 }
 0x780   :  { %v1374_v36 = vadd.f32 %v2201_v39, %v1373_v19 }
 0x782   :  { %v2952_v20 = vadd.f32 %v1374_v36, %v2871_v15  ;;  %v2955_v40 = vadd.f32 %v1374_v36, %v2873_v16  ;;  %v1385_v15 = vrot.slane %v2936_v43, 6 }
 0x784   :  { %v1387_v23 = vrot.slane %v2952_v20, 6  ;;  %2143 = vmatmul.msk.f32.gmra.mxu2 %vm302_vm5, %v2952_v20  ;;  %v1390_v16 = vsel %vm554_vm11, %v1384_v22, %v1385_v15  ;;  %v1389_v26 = vsel %vm554_vm11, %v1385_v15, %v1386_v60 }
 0x785   :  { %v1394_v27 = vsel %vm155_vm12, 0.0, %v1389_v26 }
 0x786   :  { %v1391_v10 = vsel %vm554_vm11, %v1387_v23, %v1384_v22  ;;  %v1388_v28 = vsel %vm554_vm11, %v1386_v60, %v1387_v23 }
 0x787   :  { %v1392_v13 = vsel %vm153_vm10, 0.0, %v1391_v10 }
 0x788   :  { %2144 = vmatmul.msk.f32.vlgmr.msra.gmra.mxu3 %vm302_vm5, %v1392_v13 }
 0x790   :  { %2145 = vmatmul.msk.f32.gmra.mxu3 %vm302_vm5, %v1390_v16 }
 0x798   :  { %2146 = vmatmul.msk.f32.gmra.mxu3 %vm302_vm5, %v1394_v27 }
 0x7a0   :  { %2147 = vmatmul.msk.f32.gmra.mxu3 %vm302_vm5, %v1388_v28 }
 0x7ef   :  { %v1435_v58 = vpop.f32.mrf.mxu2 }
 0x7f7   :  { %v1438_v12 = vpop.f32.mrf.mxu2 }
 0x7ff   :  { %v1441_v50 = vpop.f32.mrf.mxu2 }
 0x807   :  { %v1444_v61 = vpop.f32.mrf.mxu2 }
 0x80b   :  { %v1476_v29 = vpop.f32.mrf.mxu3 }
 0x80c   :  { %v1477_v30 = vadd.f32 %v1476_v29, %v1435_v58 }
 0x80e   :  { %v2982_v31 = vadd.f32 %v2202_v0, %v1477_v30 }
 0x810   :  { %v2149_v25 = vmul.f32 -1.442695, %v2982_v31 }
 0x812   :  { %2304 = vpow2.f32 %v2149_v25 }
 0x813   :  { %v1479_v32 = vpop.f32.mrf.mxu3 }
 0x814   :  { %v1480_v46 = vadd.f32 %v1479_v32, %v1438_v12 }
 0x816   :  { %v2985_v48 = vadd.f32 %v2202_v0, %v1480_v46 }
 0x818   :  { %v2305_v45 = vpop.eup %2304  ;;  %v2150_v7 = vmul.f32 -1.442695, %v2985_v48 }
 0x819   :  { %v1513_v52 = vadd.f32 1.0, %v2305_v45 }
 0x81a   :  { %2306 = vpow2.f32 %v2150_v7 }
 0x81b   :  { %2308 = vrcp.f32 %v1513_v52  ;;  %v1482_v14 = vpop.f32.mrf.mxu3  ;;  %v1528_v34 = vand.u32 2147483648, %v1513_v52  ;;  %v1526_v8 = vand.u32 2147483647, %v1513_v52  ;;  %vm1522_vm11 = vweird.f32 %v1513_v52 }
 0x81c   :  { %v1483_v53 = vadd.f32 %v1482_v14, %v1441_v50 }
 0x81d   :  { %v1529_v49 = vor.u32 1.1754944e-38, %v1528_v34  ;;  %vm1527_vm0 = vcmp.eq.f32.partialorder %v1526_v8, 8.507059e+37 }
 0x81e   :  { %v2988_v33 = vadd.f32 %v2202_v0, %v1483_v53 }
 0x820   :  { %v2307_v21 = vpop.eup %2306  ;;  %v2151_v54 = vmul.f32 -1.442695, %v2988_v33 }
 0x821   :  { %v2309_v24 = vpop.eup %2308  ;;  %v1514_v55 = vadd.f32 1.0, %v2307_v21 }
 0x822   :  { %2310 = vpow2.f32 %v2151_v54  ;;  %v1518_v59 = vmul.f32 %v2309_v24, %v1513_v52  ;;  %vm1523_vm10 = vweird.f32 %v2309_v24 }
 0x823   :  { %2312 = vrcp.f32 %v1514_v55  ;;  %v1485_v62 = vpop.f32.mrf.mxu3  ;;  %vm1524_vm12 = vmor %vm1522_vm11, %vm1523_vm10  ;;  %v1543_v36 = vand.u32 2147483648, %v1514_v55  ;;  %v1541_v23 = vand.u32 2147483647, %v1514_v55  ;;  %vm1537_vm6 = vweird.f32 %v1514_v55 }
 0x824   :  { %v1486_v3 = vadd.f32 %v1485_v62, %v1444_v61  ;;  %v1519_v63 = vsub.f32 1.0, %v1518_v59  ;;  %v1599_v59 = vld [vmem:[#allocation7 + $0x88] sm:$0xff]  ;;  %v1598_v61 = vld [vmem:[#allocation7 + $0x80] sm:$0xff]  ;;  %v1677_v62 = vld [vmem:[#allocation5 + $0xb8] sm:$0xff] }
 0x825   :  { %v1544_v60 = vor.u32 1.1754944e-38, %v1543_v36  ;;  %vm1542_vm14 = vcmp.eq.f32.partialorder %v1541_v23, 8.507059e+37  ;;  %1633 = vmatpush.msra.mxu0 %v1599_v59  ;;  %1702 = vmatpush.msra.mxu1 %v1677_v62 }
 0x826   :  { %v2991_v6 = vadd.f32 %v2202_v0, %v1486_v3  ;;  %v1520_v42 = vmul.f32 %v2309_v24, %v1519_v63 }
 0x827   :  { %1634 = vmatpush.msra.mxu0 %v1598_v61 }
 0x828   :  { %v2311_v9 = vpop.eup %2310  ;;  %v2152_v39 = vmul.f32 -1.442695, %v2991_v6  ;;  %v1521_v37 = vadd.f32 %v2309_v24, %v1520_v42 }
 0x829   :  { %v2313_v44 = vpop.eup %2312  ;;  %v1515_v47 = vadd.f32 1.0, %v2311_v9 }
 0x82a   :  { %2314 = vpow2.f32 %v2152_v39  ;;  %v1525_v17 = vsel %vm1524_vm12, %v2309_v24, %v1521_v37  ;;  %v1533_v51 = vmul.f32 %v2313_v44, %v1514_v55  ;;  %vm1538_vm1 = vweird.f32 %v2313_v44 }
 0x82b   :  { %2316 = vrcp.f32 %v1515_v47  ;;  %v1530_v56 = vsel %vm1527_vm0, %v1529_v49, %v1525_v17  ;;  %vm1539_vm7 = vmor %vm1537_vm6, %vm1538_vm1  ;;  %v1558_v0 = vand.u32 2147483648, %v1515_v47  ;;  %v1556_v30 = vand.u32 2147483647, %v1515_v47  ;;  %v1674_v49 = vld [vmem:[#allocation5 + $0xa0] sm:$0xff]  ;;  %v1671_v17 = vld [vmem:[#allocation2 + $0xb0] sm:$0xff] }
 0x82c   :  { %1581 = vrot.lane.b32.xlu1 %v1530_v56, %s2459_s19  ;;  %v1534_v19 = vsub.f32 1.0, %v1533_v51  ;;  %vm1552_vm2 = vweird.f32 %v1515_v47  ;;  %v1670_v51 = vld [vmem:[#allocation2 + $0xa8] sm:$0xff]  ;;  %v1669_v56 = vld [vmem:[#allocation2 + $0xa0] sm:$0xff]  ;;  %vm3130_vm12 = vcmp.lt.s32.totalorder %v2552_v2, 4  ;;  %vm3131_vm0 = vcmp.lt.s32.totalorder %v2555_v4, 4 }
 0x82d   :  { %v1559_v32 = vor.u32 1.1754944e-38, %v1558_v0  ;;  %vm1557_vm4 = vcmp.eq.f32.partialorder %v1556_v30, 8.507059e+37 }
 0x82e   :  { %v1535_v22 = vmul.f32 %v2313_v44, %v1534_v19 }
 0x830   :  { %v2315_v10 = vpop.eup %2314  ;;  %v1536_v13 = vadd.f32 %v2313_v44, %v1535_v22 }
 0x831   :  { %v2317_v15 = vpop.eup %2316  ;;  %v1516_v16 = vadd.f32 1.0, %v2315_v10 }
 0x832   :  { %v1540_v26 = vsel %vm1539_vm7, %v2313_v44, %v1536_v13  ;;  %v1548_v27 = vmul.f32 %v2317_v15, %v1515_v47  ;;  %vm1553_vm15 = vweird.f32 %v2317_v15  ;;  %v1675_v47 = vld [vmem:[#allocation5 + $0xa8] sm:$0xff] }
 0x833   :  { %2318 = vrcp.f32 %v1516_v16  ;;  %v1545_v28 = vsel %vm1542_vm14, %v1544_v60, %v1540_v26  ;;  %vm1554_vm3 = vmor %vm1552_vm2, %vm1553_vm15  ;;  %v1573_v52 = vand.u32 2147483648, %v1516_v16  ;;  %v1571_v53 = vand.u32 2147483647, %v1516_v16 }
 0x834   :  { %1583 = vrot.lane.b32.xlu2 %v1545_v28, %s2459_s19  ;;  %v1549_v58 = vsub.f32 1.0, %v1548_v27  ;;  %vm1567_vm13 = vweird.f32 %v1516_v16  ;;  %2320 = vtanh.f32 %v2982_v31 }
 0x835   :  { %v1574_v54 = vor.u32 1.1754944e-38, %v1573_v52  ;;  %vm1572_vm11 = vcmp.eq.f32.partialorder %v1571_v53, 8.507059e+37  ;;  %2322 = vtanh.f32 %v2985_v48  ;;  %v1676_v48 = vld [vmem:[#allocation5 + $0xb0] sm:$0xff] }
 0x836   :  { %v1550_v29 = vmul.f32 %v2317_v15, %v1549_v58  ;;  %2324 = vtanh.f32 %v2988_v33  ;;  %1703 = vmatpush.msra.mxu1 %v1676_v48  ;;  %v1672_v33 = vld [vmem:[#allocation2 + $0xb8] sm:$0xff] }
 0x837   :  { %2326 = vtanh.f32 %v2991_v6  ;;  %1743 = vmatpush.msrb.mxu2 %v1672_v33  ;;  %v2203_v6 = vld [vmem:[%s3122_s8 + $0x4] ss:$0 sm:$0xff] }
 0x838   :  { %v1551_v12 = vadd.f32 %v2317_v15, %v1550_v29  ;;  %1704 = vmatpush.msra.mxu1 %v1675_v47 }
 0x839   :  { %v2319_v25 = vpop.eup %2318  ;;  %1744 = vmatpush.msrb.mxu2 %v1671_v17 }
 0x83a   :  { %v1555_v46 = vsel %vm1554_vm3, %v2317_v15, %v1551_v12  ;;  %v1563_v45 = vmul.f32 %v2319_v25, %v1516_v16  ;;  %vm1568_vm8 = vweird.f32 %v2319_v25  ;;  %v2321_v3 = vpop.eup %2320  ;;  %1705 = vmatpush.msra.mxu1 %v1674_v49  ;;  %v1871_v49 = vld [vmem:[#allocation7 + $0xa8] sm:$0xff] }
 0x83b   :  { %v1560_v7 = vsel %vm1557_vm4, %v1559_v32, %v1555_v46  ;;  %vm1569_vm10 = vmor %vm1567_vm13, %vm1568_vm8  ;;  %v2323_v34 = vpop.eup %2322  ;;  %1745 = vmatpush.msrb.mxu2 %v1670_v51  ;;  %v2204_v32 = vld [vmem:[%s3120_s6 + $0x5] ss:$0 sm:$0xff] }
 0x83c   :  { %1585 = vrot.lane.b32.xlu0 %v1560_v7, %s2459_s19  ;;  %v1564_v50 = vsub.f32 1.0, %v1563_v45  ;;  %v2325_v8 = vpop.eup %2324 }
 0x83d   :  { %v2327_v31 = vpop.eup %2326  ;;  %1746 = vmatpush.msrb.mxu2 %v1669_v56 }
 0x83e   :  { %v1565_v14 = vmul.f32 %v2319_v25, %v1564_v50 }
 0x840   :  { %v1566_v21 = vadd.f32 %v2319_v25, %v1565_v14 }
 0x842   :  { %v1570_v24 = vsel %vm1569_vm10, %v2319_v25, %v1566_v21 }
 0x843   :  { %v1575_v55 = vsel %vm1572_vm11, %v1574_v54, %v1570_v24 }
 0x844   :  { %1587 = vrot.lane.b32.xlu1 %v1575_v55, %s2459_s19 }
 0x88e   :  { %v1584_v11 = vpop.permute.xlu2 %1583 }
 0x88f   :  { %v1594_v42 = vmul.f32 %v2323_v34, %v1584_v11 }
 0x89e   :  { %v1582_v63 = vpop.permute.xlu1 %1581 }
 0x89f   :  { %v1593_v5 = vmul.f32 %v2321_v3, %v1582_v63 }
 0x8a1   :  { %2154 = vmatmul.msk.f32.vlgmr.msra.gmra.mxu0 %vm302_vm5, %v1593_v5 }
 0x8a9   :  { %2155 = vmatmul.msk.f32.gmra.mxu0 %vm302_vm5, %v1594_v42 }
 0x8ae   :  { %v1586_v9 = vpop.permute.xlu0 %1585 }
 0x8af   :  { %v1595_v39 = vmul.f32 %v2325_v8, %v1586_v9 }
 0x8b1   :  { %2156 = vmatmul.msk.f32.gmra.mxu0 %vm302_vm5, %v1595_v39  ;;  %v1873_v39 = vld [vmem:[#allocation7 + $0xb8] sm:$0xff] }
 0x8b2   :  { %1903 = vmatpush.msrb.mxu3 %v1873_v39 }
 0x8b6   :  { %v1588_v37 = vpop.permute.xlu1 %1587 }
 0x8b7   :  { %v1596_v44 = vmul.f32 %v2327_v31, %v1588_v37  ;;  %v1872_v31 = vld [vmem:[#allocation7 + $0xb0] sm:$0xff] }
 0x8b8   :  { %1904 = vmatpush.msrb.mxu3 %v1872_v31 }
 0x8b9   :  { %2157 = vmatmul.msk.f32.gmra.mxu0 %vm302_vm5, %v1596_v44 }
 0x8ba   :  { %1905 = vmatpush.msrb.mxu3 %v1871_v49  ;;  %v1929_v49 = vld [vmem:[%s3123_s9 + $0x8] sm:$0xff] }
 0x91e   :  { %v1636_v19 = vpop.f32.mrf.mxu0 }
 0x91f   :  { %v1637_v36 = vadd.f32 %v2203_v6, %v1636_v19 }
 0x921   :  { %v1648_v22 = vadd.f32 %v1637_v36, %v2928_v41  ;;  %v3011_v23 = vadd.f32 %v1637_v36, %v2931_v35 }
 0x923   :  { %2158 = vmatmul.msk.f32.vlgmr.msra.gmra.mxu1 %vm302_vm5, %v1648_v22 }
 0x926   :  { %v1639_v10 = vpop.f32.mrf.mxu0 }
 0x927   :  { %v1640_v13 = vadd.f32 %v2203_v6, %v1639_v10 }
 0x929   :  { %v1649_v15 = vadd.f32 %v1640_v13, %v2936_v43  ;;  %v3016_v16 = vadd.f32 %v1640_v13, %v2939_v38  ;;  %v1656_v38 = vrot.slane %v1648_v22, 4 }
 0x92b   :  { %2159 = vmatmul.msk.f32.gmra.mxu1 %vm302_vm5, %v1649_v15 }
 0x92e   :  { %v1642_v60 = vpop.f32.mrf.mxu0 }
 0x92f   :  { %v1643_v26 = vadd.f32 %v2203_v6, %v1642_v60 }
 0x931   :  { %v1650_v27 = vadd.f32 %v1643_v26, %v2944_v18  ;;  %v3021_v41 = vadd.f32 %v1643_v26, %v2947_v57  ;;  %v1657_v57 = vrot.slane %v1649_v15, 4 }
 0x933   :  { %2160 = vmatmul.msk.f32.gmra.mxu1 %vm302_vm5, %v1650_v27  ;;  %v1662_v30 = vsel %vm835_vm9, %v1656_v38, %v1657_v57 }
 0x936   :  { %v1645_v35 = vpop.f32.mrf.mxu0 }
 0x937   :  { %v1646_v28 = vadd.f32 %v2203_v6, %v1645_v35 }
 0x939   :  { %v1651_v58 = vadd.f32 %v1646_v28, %v2952_v20  ;;  %v3026_v43 = vadd.f32 %v1646_v28, %v2955_v40  ;;  %v1658_v20 = vrot.slane %v1650_v27, 4 }
 0x93b   :  { %v1659_v0 = vrot.slane %v1651_v58, 4  ;;  %2161 = vmatmul.msk.f32.gmra.mxu1 %vm302_vm5, %v1651_v58  ;;  %v1661_v40 = vsel %vm835_vm9, %v1657_v57, %v1658_v20 }
 0x93c   :  { %v1666_v12 = vsel %vm3131_vm0, 0.0, %v1661_v40 }
 0x93d   :  { %v1663_v29 = vsel %vm835_vm9, %v1659_v0, %v1656_v38  ;;  %v1660_v2 = vsel %vm835_vm9, %v1658_v20, %v1659_v0 }
 0x93e   :  { %v1664_v18 = vsel %vm3130_vm12, 0.0, %v1663_v29 }
 0x93f   :  { %2162 = vmatmul.msk.f32.vlgmr.msrb.gmra.mxu2 %vm302_vm5, %v1664_v18 }
 0x947   :  { %2163 = vmatmul.msk.f32.gmra.mxu2 %vm302_vm5, %v1662_v30 }
 0x94f   :  { %2164 = vmatmul.msk.f32.gmra.mxu2 %vm302_vm5, %v1666_v12 }
 0x957   :  { %2165 = vmatmul.msk.f32.gmra.mxu2 %vm302_vm5, %v1660_v2 }
 0x9a0   :  { %v1707_v25 = vpop.f32.mrf.mxu1 }
 0x9a8   :  { %v1710_v50 = vpop.f32.mrf.mxu1 }
 0x9b0   :  { %v1713_v54 = vpop.f32.mrf.mxu1 }
 0x9b8   :  { %v1716_v34 = vpop.f32.mrf.mxu1 }
 0x9c2   :  { %v1748_v46 = vpop.f32.mrf.mxu2 }
 0x9c3   :  { %v1749_v45 = vadd.f32 %v1748_v46, %v1707_v25 }
 0x9c5   :  { %v3048_v7 = vadd.f32 %v2204_v32, %v1749_v45 }
 0x9c7   :  { %v2167_v4 = vmul.f32 -1.442695, %v3048_v7 }
 0x9c9   :  { %2328 = vpow2.f32 %v2167_v4 }
 0x9ca   :  { %v1751_v52 = vpop.f32.mrf.mxu2 }
 0x9cb   :  { %v1752_v14 = vadd.f32 %v1751_v52, %v1710_v50 }
 0x9cd   :  { %v3051_v53 = vadd.f32 %v2204_v32, %v1752_v14 }
 0x9cf   :  { %v2329_v1 = vpop.eup %2328  ;;  %v2168_v21 = vmul.f32 -1.442695, %v3051_v53 }
 0x9d0   :  { %v1785_v24 = vadd.f32 1.0, %v2329_v1 }
 0x9d1   :  { %2330 = vpow2.f32 %v2168_v21 }
 0x9d2   :  { %2332 = vrcp.f32 %v1785_v24  ;;  %v1754_v55 = vpop.f32.mrf.mxu2  ;;  %v1800_v37 = vand.u32 2147483648, %v1785_v24  ;;  %v1798_v47 = vand.u32 2147483647, %v1785_v24  ;;  %vm1794_vm1 = vweird.f32 %v1785_v24 }
 0x9d3   :  { %v1755_v59 = vadd.f32 %v1754_v55, %v1713_v54  ;;  %v1870_v55 = vld [vmem:[#allocation7 + $0xa0] sm:$0xff] }
 0x9d4   :  { %v1801_v19 = vor.u32 1.1754944e-38, %v1800_v37  ;;  %vm1799_vm7 = vcmp.eq.f32.partialorder %v1798_v47, 8.507059e+37  ;;  %1906 = vmatpush.msrb.mxu3 %v1870_v55  ;;  %v1930_v47 = vld [vmem:[%s3123_s9 + $0x10] sm:$0xff] }
 0x9d5   :  { %v3054_v61 = vadd.f32 %v2204_v32, %v1755_v59 }
 0x9d7   :  { %v2331_v62 = vpop.eup %2330  ;;  %v2169_v3 = vmul.f32 -1.442695, %v3054_v61 }
 0x9d8   :  { %v2333_v63 = vpop.eup %2332  ;;  %v1786_v5 = vadd.f32 1.0, %v2331_v62 }
 0x9d9   :  { %2334 = vpow2.f32 %v2169_v3  ;;  %v1790_v11 = vmul.f32 %v2333_v63, %v1785_v24  ;;  %vm1795_vm9 = vweird.f32 %v2333_v63 }
 0x9da   :  { %2336 = vrcp.f32 %v1786_v5  ;;  %v1757_v42 = vpop.f32.mrf.mxu2  ;;  %vm1796_vm6 = vmor %vm1794_vm1, %vm1795_vm9  ;;  %v1815_v15 = vand.u32 2147483648, %v1786_v5  ;;  %v1813_v26 = vand.u32 2147483647, %v1786_v5  ;;  %vm1809_vm15 = vweird.f32 %v1786_v5 }
 0x9db   :  { %v1758_v8 = vadd.f32 %v1757_v42, %v1716_v34  ;;  %v1791_v9 = vsub.f32 1.0, %v1790_v11  ;;  %vm1994_vm1 = vcmask 64512  }
 0x9dc   :  { %v1816_v38 = vor.u32 1.1754944e-38, %v1815_v15  ;;  %vm1814_vm3 = vcmp.eq.f32.partialorder %v1813_v26, 8.507059e+37 }
 0x9dd   :  { %v3057_v44 = vadd.f32 %v2204_v32, %v1758_v8  ;;  %v1792_v48 = vmul.f32 %v2333_v63, %v1791_v9 }
 0x9df   :  { %v2335_v33 = vpop.eup %2334  ;;  %v2170_v17 = vmul.f32 -1.442695, %v3057_v44  ;;  %v1793_v51 = vadd.f32 %v2333_v63, %v1792_v48 }
 0x9e0   :  { %v2337_v6 = vpop.eup %2336  ;;  %v1787_v56 = vadd.f32 1.0, %v2335_v33 }
 0x9e1   :  { %2338 = vpow2.f32 %v2170_v17  ;;  %v1797_v36 = vsel %vm1796_vm6, %v2333_v63, %v1793_v51  ;;  %v1805_v22 = vmul.f32 %v2337_v6, %v1786_v5  ;;  %vm1810_vm14 = vweird.f32 %v2337_v6 }
 0x9e2   :  { %2340 = vrcp.f32 %v1787_v56  ;;  %v1802_v10 = vsel %vm1799_vm7, %v1801_v19, %v1797_v36  ;;  %vm1811_vm2 = vmor %vm1809_vm15, %vm1810_vm14  ;;  %v1830_v30 = vand.u32 2147483648, %v1787_v56  ;;  %v1828_v40 = vand.u32 2147483647, %v1787_v56 }
 0x9e3   :  { %1853 = vrot.lane.b32.xlu2 %v1802_v10, %s2459_s19  ;;  %v1806_v13 = vsub.f32 1.0, %v1805_v22  ;;  %vm1824_vm8 = vweird.f32 %v1787_v56 }
 0x9e4   :  { %v1831_v25 = vor.u32 1.1754944e-38, %v1830_v30  ;;  %vm1829_vm10 = vcmp.eq.f32.partialorder %v1828_v40, 8.507059e+37 }
 0x9e5   :  { %v1807_v60 = vmul.f32 %v2337_v6, %v1806_v13 }
 0x9e7   :  { %v2339_v27 = vpop.eup %2338  ;;  %v1808_v35 = vadd.f32 %v2337_v6, %v1807_v60 }
 0x9e8   :  { %v2341_v28 = vpop.eup %2340  ;;  %v1788_v58 = vadd.f32 1.0, %v2339_v27 }
 0x9e9   :  { %v1812_v0 = vsel %vm1811_vm2, %v2337_v6, %v1808_v35  ;;  %v1820_v29 = vmul.f32 %v2341_v28, %v1787_v56  ;;  %vm1825_vm4 = vweird.f32 %v2341_v28 }
 0x9ea   :  { %2342 = vrcp.f32 %v1788_v58  ;;  %v1817_v18 = vsel %vm1814_vm3, %v1816_v38, %v1812_v0  ;;  %vm1826_vm13 = vmor %vm1824_vm8, %vm1825_vm4  ;;  %v1845_v4 = vand.u32 2147483648, %v1788_v58  ;;  %v1843_v14 = vand.u32 2147483647, %v1788_v58 }
 0x9eb   :  { %1855 = vrot.lane.b32.xlu0 %v1817_v18, %s2459_s19  ;;  %v1821_v57 = vsub.f32 1.0, %v1820_v29  ;;  %vm1839_vm12 = vweird.f32 %v1788_v58  ;;  %2344 = vtanh.f32 %v3048_v7 }
 0x9ec   :  { %v1846_v21 = vor.u32 1.1754944e-38, %v1845_v4  ;;  %vm1844_vm9 = vcmp.eq.f32.partialorder %v1843_v14, 8.507059e+37  ;;  %2346 = vtanh.f32 %v3051_v53  ;;  %v2205_v53 = vld [vmem:[%s3122_s8 + $0x5] ss:$0 sm:$0xff] }
 0x9ed   :  { %v1822_v20 = vmul.f32 %v2341_v28, %v1821_v57  ;;  %2348 = vtanh.f32 %v3054_v61 }
 0x9ee   :  { %2350 = vtanh.f32 %v3057_v44  ;;  %v1931_v44 = vld [vmem:[%s3123_s9 + $0x18] sm:$0xff] }
 0x9ef   :  { %v1823_v12 = vadd.f32 %v2341_v28, %v1822_v20  ;;  %1968 = vmatpush.msrb.mxu0 %v1931_v44 }
 0x9f0   :  { %v2343_v2 = vpop.eup %2342 }
 0x9f1   :  { %v1827_v32 = vsel %vm1826_vm13, %v2341_v28, %v1823_v12  ;;  %v1835_v46 = vmul.f32 %v2343_v2, %v1788_v58  ;;  %vm1840_vm11 = vweird.f32 %v2343_v2  ;;  %v2345_v59 = vpop.eup %2344  ;;  %1969 = vmatpush.msrb.mxu0 %v1930_v47 }
 0x9f2   :  { %v1832_v45 = vsel %vm1829_vm10, %v1831_v25, %v1827_v32  ;;  %vm1841_vm0 = vmor %vm1839_vm12, %vm1840_vm11  ;;  %v2347_v63 = vpop.eup %2346  ;;  %v2207_v25 = vld [vmem:[%s3126_s12] ss:$0 sm:$0xff] }
 0x9f3   :  { %1857 = vrot.lane.b32.xlu1 %v1832_v45, %s2459_s19  ;;  %v1836_v50 = vsub.f32 1.0, %v1835_v46  ;;  %v2349_v34 = vpop.eup %2348  ;;  %1970 = vmatpush.msrb.mxu0 %v1929_v49 }
 0x9f4   :  { %v2351_v9 = vpop.eup %2350 }
 0x9f5   :  { %v1837_v52 = vmul.f32 %v2343_v2, %v1836_v50 }
 0x9f7   :  { %v1838_v1 = vadd.f32 %v2343_v2, %v1837_v52 }
 0x9f9   :  { %v1842_v54 = vsel %vm1841_vm0, %v2343_v2, %v1838_v1 }
 0x9fa   :  { %v1847_v24 = vsel %vm1844_vm9, %v1846_v21, %v1842_v54 }
 0x9fb   :  { %1859 = vrot.lane.b32.xlu2 %v1847_v24, %s2459_s19 }
 0xa3d   :  { %v1854_v62 = vpop.permute.xlu2 %1853 }
 0xa3e   :  { %v1865_v3 = vmul.f32 %v2345_v59, %v1854_v62 }
 0xa40   :  { %2172 = vmatmul.msk.f32.vlgmr.msrb.gmra.mxu3 %vm302_vm5, %v1865_v3 }
 0xa55   :  { %v1860_v7 = vpop.permute.xlu2 %1859 }
 0xa56   :  { %v1868_v39 = vmul.f32 %v2351_v9, %v1860_v7 }
 0xa5d   :  { %v1856_v5 = vpop.permute.xlu0 %1855 }
 0xa5e   :  { %v1866_v11 = vmul.f32 %v2347_v63, %v1856_v5 }
 0xa60   :  { %2173 = vmatmul.msk.f32.gmra.mxu3 %vm302_vm5, %v1866_v11 }
 0xa65   :  { %v1858_v42 = vpop.permute.xlu1 %1857 }
 0xa66   :  { %v1867_v8 = vmul.f32 %v2349_v34, %v1858_v42 }
 0xa68   :  { %2174 = vmatmul.msk.f32.gmra.mxu3 %vm302_vm5, %v1867_v8 }
 0xa70   :  { %2175 = vmatmul.msk.f32.gmra.mxu3 %vm302_vm5, %v1868_v39 }
 0xac3   :  { %v1908_v31 = vpop.f32.mrf.mxu3 }
 0xac4   :  { %v1909_v61 = vadd.f32 %v2205_v53, %v1908_v31 }
 0xac6   :  { %v1920_v37 = vadd.f32 %v1909_v61, %v3011_v23  ;;  %v1928_v23 = vld [vmem:[%s3123_s9] sm:$0xff] }
 0xac7   :  { %1971 = vmatpush.msrb.mxu0 %v1928_v23 }
 0xac8   :  { %v1924_v48 = vmax.f32 %v1920_v37, 0.0 }
 0xaca   :  { %1940 = vrot.lane.b32.xlu0 %v1924_v48, %s2459_s19 }
 0xae3   :  { %v1911_v33 = vpop.f32.mrf.mxu3 }
 0xae4   :  { %v1912_v17 = vadd.f32 %v2205_v53, %v1911_v33 }
 0xae6   :  { %v1921_v51 = vadd.f32 %v1912_v17, %v3016_v16  ;;  %v1989_v16 = vld [vmem:[%s3125_s11] sm:$0xff] }
 0xae7   :  { %2022 = vmatpush.msrb.mxu1 %v1989_v16 }
 0xae8   :  { %v1925_v6 = vmax.f32 %v1921_v51, 0.0 }
 0xaea   :  { %1942 = vrot.lane.b32.xlu1 %v1925_v6, %s2459_s19 }
 0xaeb   :  { %v1914_v56 = vpop.f32.mrf.mxu3 }
 0xaec   :  { %v1915_v19 = vadd.f32 %v2205_v53, %v1914_v56 }
 0xaee   :  { %v1922_v36 = vadd.f32 %v1915_v19, %v3021_v41 }
 0xaf0   :  { %v1926_v22 = vmax.f32 %v1922_v36, 0.0 }
 0xaf2   :  { %1944 = vrot.lane.b32.xlu2 %v1926_v22, %s2459_s19 }
 0xaf3   :  { %v1917_v10 = vpop.f32.mrf.mxu3 }
 0xaf4   :  { %v1918_v13 = vadd.f32 %v2205_v53, %v1917_v10 }
 0xaf6   :  { %v1923_v15 = vadd.f32 %v1918_v13, %v3026_v43  ;;  %v2206_v43 = vld [vmem:[%s3124_s10] ss:$0 sm:$0xff]  ;;  %s2460_s10 = smov [#allocation8]  }
 0xaf7   :  { %s2044_s27 = sshll.u32 %s2460_s10, 4  ;;  %s2045_s27 = int_to_ptr.vmem [resolvable:$true] %s2044_s27 }
 0xaf8   :  { %v1927_v60 = vmax.f32 %v1923_v15, 0.0 }
 0xafa   :  { %1946 = vrot.lane.b32.xlu0 %v1927_v60, %s2459_s19 }
 0xb3c   :  { %v1941_v26 = vpop.permute.xlu0 %1940 }
 0xb3d   :  { %2176 = vmatmul.msk.f32.vlgmr.msrb.gmra.mxu0 %vm302_vm5, %v1941_v26 }
 0xb4c   :  { %v1945_v41 = vpop.permute.xlu2 %1944 }
 0xb5c   :  { %v1943_v27 = vpop.permute.xlu1 %1942 }
 0xb5d   :  { %2177 = vmatmul.msk.f32.gmra.mxu0 %vm302_vm5, %v1943_v27 }
 0xb65   :  { %2178 = vmatmul.msk.f32.gmra.mxu0 %vm302_vm5, %v1945_v41 }
 0xb6c   :  { %v1947_v35 = vpop.permute.xlu0 %1946 }
 0xb6d   :  { %2179 = vmatmul.msk.f32.gmra.mxu0 %vm302_vm5, %v1947_v35 }
 0xbba   :  { %v1973_v28 = vpop.f32.mrf.mxu0 }
 0xbbb   :  { %v1974_v58 = vadd.f32 %v2206_v43, %v1973_v28 }
 0xbbd   :  { %v1985_v38 = vmax.f32 %v1974_v58, 0.0 }
 0xbbf   :  { %2180 = vmatmul.msk.f32.vlgmr.msrb.gmra.mxu1 %vm1994_vm1, %v1985_v38 }
 0xbda   :  { %v1976_v0 = vpop.f32.mrf.mxu0 }
 0xbdb   :  { %v1977_v29 = vadd.f32 %v2206_v43, %v1976_v0 }
 0xbdd   :  { %v1986_v18 = vmax.f32 %v1977_v29, 0.0 }
 0xbdf   :  { %2181 = vmatmul.msk.f32.gmra.mxu1 %vm1994_vm1, %v1986_v18 }
 0xbe2   :  { %v1979_v57 = vpop.f32.mrf.mxu0 }
 0xbe3   :  { %v1980_v30 = vadd.f32 %v2206_v43, %v1979_v57 }
 0xbe5   :  { %v1987_v20 = vmax.f32 %v1980_v30, 0.0 }
 0xbe7   :  { %2182 = vmatmul.msk.f32.gmra.mxu1 %vm1994_vm1, %v1987_v20 }
 0xbea   :  { %v1982_v40 = vpop.f32.mrf.mxu0 }
 0xbeb   :  { %v1983_v12 = vadd.f32 %v2206_v43, %v1982_v40 }
 0xbed   :  { %v1988_v2 = vmax.f32 %v1983_v12, 0.0 }
 0xbef   :  { %2183 = vmatmul.msk.f32.gmra.mxu1 %vm1994_vm1, %v1988_v2 }
 0xc3c   :  { %v2024_v32 = vpop.f32.mrf.mxu1 }
 0xc3d   :  { %v2025_v46 = vadd.f32 %v2207_v25, %v2024_v32 }
 0xc3f   :  { %2036 = vst [vmem:[#allocation8] sm:$0xff] %v2025_v46 }
 0xc5c   :  { %v2027_v45 = vpop.f32.mrf.mxu1 }
 0xc5d   :  { %v2028_v50 = vadd.f32 %v2207_v25, %v2027_v45 }
 0xc5f   :  { %2037 = vst [vmem:[#allocation8 + $0x8] sm:$0xff] %v2028_v50 }
 0xc64   :  { %v2030_v4 = vpop.f32.mrf.mxu1 }
 0xc65   :  { %v2031_v52 = vadd.f32 %v2207_v25, %v2030_v4 }
 0xc67   :  { %2038 = vst [vmem:[#allocation8 + $0x10] sm:$0xff] %v2031_v52 }
 0xc6c   :  { %v2033_v14 = vpop.f32.mrf.mxu1 }
 0xc6d   :  { %v2034_v1 = vadd.f32 %v2207_v25, %v2033_v14 }
 0xc6f   :  { %2039 = vst [vmem:[#allocation8 + $0x18] sm:$0xff] %v2034_v1 }
 0xc70   :  { %2052 = dma.vmem_to_hbm [thread:$0]  %s2045_s27, 512, %s2047_s2, [#allocation4], %s2455_s16, %s2455_s16, %s2456_s17  }
 0xc71   :  { %2452 = dma.done.wait [#allocation4], 512  }
 0xc72   :  { %2453 = vsyncadd [#allocation4], 4294966784 }
 0xc73   :  { %2057 = vsyncpa [#allocation3], 1 }
 0xc74   :  { %2058 = vsyncpa [#allocation6], 1 }
 0xc75   :  { %2059 = vsyncpa [#allocation4], 1 }

</bundles_post_ra>
